<compile_context>
chip_gen: v7x
topology: tpu7x:2x2x1
jax: 0.10.0
libtpu: 0.0.40
codegen_flags: <defaults>
</compile_context>

<pallas_src>
import functools

import jax
import jax.numpy as jnp
import numpy as np
from jax import lax
from jax.experimental import pallas as pl
from jax.experimental.pallas import tpu as pltpu


def _round_up(x, m):
    return (x + m - 1) // m * m


# ----------------------------------------------------------------------------
# Fused Pallas kernel: 3 x (3x3 conv + folded BN affine + ReLU), + optional y
# ----------------------------------------------------------------------------
def _recurr_conv_block_kernel(*refs, H, W, C, C_in, N, has_y):
    # inputs : x (N, C_in, HW), [y (N, C, HW)], w_all (3, C, 9*C), shift (3, C, 1)
    # outputs: x_out (N, C, HW), state_out (N, C, HW)
    # scratch: patches (9*C, N*HW) f32 VMEM
    if has_y:
        x_ref, y_ref, w_ref, shift_ref, x_out_ref, s_out_ref, patches_ref = refs
    else:
        x_ref, w_ref, shift_ref, x_out_ref, s_out_ref, patches_ref = refs
        y_ref = None

    HW = H * W
    NHW = N * HW
    PAD = W + 1  # halo on each side of a (per-batch) flattened spatial row

    # Column index within an image row; the pattern repeats correctly across
    # the batches laid side-by-side on the lane axis (HW % W == 0).
    col = lax.broadcasted_iota(jnp.int32, (1, NHW), 1) % W
    keep_l = col != (W - 1)  # for dx==0 taps: zero the source's last column
    keep_r = col != 0        # for dx==2 taps: zero the source's first column
    zero_halo = jnp.zeros((C, PAD), jnp.float32)

    def conv_bn_relu(inp, stage):
        # inp: (C, N*HW) f32 — channels on sublanes, batches side-by-side on lanes.
        # Two selects per stage replace the previous six per-tap edge masks:
        # zeroing col W-1 (resp. col 0) of the *source* makes every row-wrapping
        # read of a dx==0 (resp. dx==2) tap return 0, and never touches a valid tap.
        inp_l = jnp.where(keep_l, inp, 0.0)
        inp_r = jnp.where(keep_r, inp, 0.0)
        for n in range(N):
            lo, hi = n * HW, (n + 1) * HW  # 256-aligned lane slices
            bufs = (
                jnp.concatenate([zero_halo, inp_l[:, lo:hi], zero_halo], axis=1),  # dx==0
                jnp.concatenate([zero_halo, inp[:, lo:hi], zero_halo], axis=1),    # dx==1
                jnp.concatenate([zero_halo, inp_r[:, lo:hi], zero_halo], axis=1),  # dx==2
            )
            for dy in range(3):
                for dx in range(3):
                    k = dy * 3 + dx
                    s = PAD + (dy - 1) * W + (dx - 1)
                    # Store the tap straight into the VMEM patches scratch at a
                    # static, 8/128-aligned offset (im2col without a concat).
                    patches_ref[k * C:(k + 1) * C, lo:hi] = bufs[dx][:, s:s + HW]
        # One MXU matmul per stage; BN scale already folded into w rows.
        acc = jnp.dot(w_ref[stage], patches_ref[...],
                      preferred_element_type=jnp.float32)          # (C, N*HW)
        return jnp.maximum(acc + shift_ref[stage], 0.0)            # shift + ReLU

    # Stage-1 input: merge batches onto the lane axis, pad channels to C
    # in-register (no wrapper-side HBM pad copy).
    xs = []
    for n in range(N):
        xn = x_ref[n].astype(jnp.float32)                          # (C_in, HW)
        if C > C_in:
            xn = jnp.concatenate(
                [xn, jnp.zeros((C - C_in, HW), jnp.float32)], axis=0)
        xs.append(xn)
    x_in = xs[0] if N == 1 else jnp.concatenate(xs, axis=1)        # (C, N*HW)

    state1 = conv_bn_relu(x_in, 0)
    if has_y:
        if N == 1:
            y_in = y_ref[0].astype(jnp.float32)
        else:
            y_in = jnp.concatenate(
                [y_ref[n].astype(jnp.float32) for n in range(N)], axis=1)
        h = state1 + y_in
    else:
        h = state1
    x2 = conv_bn_relu(h, 1)
    state2 = conv_bn_relu(x2, 2)

    for n in range(N):
        lo, hi = n * HW, (n + 1) * HW
        x_out_ref[n] = x2[:, lo:hi].astype(x_out_ref.dtype)
        s_out_ref[n] = state2[:, lo:hi].astype(s_out_ref.dtype)


# ----------------------------------------------------------------------------
# Parameter construction (deterministic, synthetic, matches module __init__)
# ----------------------------------------------------------------------------
def make_params(key, ch_in, ch_out, eps=1e-5):
    params = []
    c_in = ch_in
    for _ in range(3):
        key, kw, kb = jax.random.split(key, 3)
        w = jax.random.normal(kw, (3, 3, c_in, ch_out), jnp.float32) * 0.1
        b = jax.random.normal(kb, (ch_out,), jnp.float32) * 0.1
        # BatchNorm2d init: gamma=1, beta=0, running_mean=0, running_var=1
        gamma = jnp.ones((ch_out,), jnp.float32)
        beta = jnp.zeros((ch_out,), jnp.float32)
        r_mean = jnp.zeros((ch_out,), jnp.float32)
        r_var = jnp.ones((ch_out,), jnp.float32)
        scale = gamma / jnp.sqrt(r_var + eps)
        shift = beta - r_mean * scale
        params.append(dict(w=w, b=b, scale=scale, shift=shift))
        c_in = ch_out
    return params


# ----------------------------------------------------------------------------
# One-time parameter packing (HOISTED out of the forward path)
# ----------------------------------------------------------------------------
def pack_params(params):
    """Pack the 3 conv+BN stages into (w_all, shift_all) for the kernel."""
    ch_in = params[0]["w"].shape[2]
    ch_out = params[0]["w"].shape[3]
    C = _round_up(max(ch_in, ch_out), 8)  # sublane-aligned channel count
    w_mats, shifts = [], []
    for p in params:
        w = p["w"]                                    # (3, 3, c_in, c_out) HWIO
        c_in, c_out = w.shape[2], w.shape[3]
        w = jnp.pad(w, ((0, 0), (0, 0), (0, C - c_in), (0, C - c_out)))
        scale = jnp.pad(p["scale"], (0, C - c_out))
        # rows = out channels; columns ordered (dy,dx)-major / c_in-minor,
        # matching the kernel's tap order.  BN scale folded into the rows.
        w_mat = jnp.transpose(w, (3, 0, 1, 2)).reshape(C, 9 * C) * scale[:, None]
        # (conv + b) * scale + shift == conv * (scale-folded w) + (shift + b*scale)
        shift = p["shift"] + p["b"] * p["scale"]
        shift = jnp.pad(shift, (0, C - c_out)).reshape(C, 1)
        w_mats.append(w_mat)
        shifts.append(shift)
    return jnp.stack(w_mats), jnp.stack(shifts)       # (3, C, 9*C), (3, C, 1)


# ----------------------------------------------------------------------------
# recurr_conv_block forward (single fused pallas_call, one grid step)
# ----------------------------------------------------------------------------
def recurr_conv_block_forward(w_all, shift_all, x_nchw, y_nchw=None, *, c_out):
    """Returns (x, state), both NCHW, matching the PyTorch module."""
    N, C_in, H, W = x_nchw.shape
    C = w_all.shape[1]
    HW = H * W

    x = x_nchw.reshape(N, C_in, HW)                   # free reshape, no pad copy

    has_y = y_nchw is not None
    operands = [x]
    in_specs = [pl.BlockSpec((N, C_in, HW), lambda i: (0, 0, 0))]
    if has_y:
        y = y_nchw.reshape(N, c_out, HW)
        if C > c_out:
            y = jnp.pad(y, ((0, 0), (0, C - c_out), (0, 0)))
        operands.append(y)
        in_specs.append(pl.BlockSpec((N, C, HW), lambda i: (0, 0, 0)))
    operands += [w_all, shift_all]
    in_specs += [
        pl.BlockSpec((3, C, 9 * C), lambda i: (0, 0, 0)),
        pl.BlockSpec((3, C, 1), lambda i: (0, 0, 0)),
    ]

    kernel = functools.partial(_recurr_conv_block_kernel,
                               H=H, W=W, C=C, C_in=C_in, N=N, has_y=has_y)

    x2, state2 = pl.pallas_call(
        kernel,
        out_shape=(jax.ShapeDtypeStruct((N, C, HW), x_nchw.dtype),
                   jax.ShapeDtypeStruct((N, C, HW), x_nchw.dtype)),
        grid_spec=pltpu.PrefetchScalarGridSpec(
            num_scalar_prefetch=0,
            grid=(1,),                                # batch folded: one step
            in_specs=in_specs,
            out_specs=(pl.BlockSpec((N, C, HW), lambda i: (0, 0, 0)),
                       pl.BlockSpec((N, C, HW), lambda i: (0, 0, 0))),
            scratch_shapes=[pltpu.VMEM((9 * C, N * HW), jnp.float32)],
        ),
        compiler_params=pltpu.CompilerParams(
            dimension_semantics=("arbitrary",)),
    )(*operands)

    if C > c_out:
        x2 = x2[:, :c_out]
        state2 = state2[:, :c_out]
    return x2.reshape(N, c_out, H, W), state2.reshape(N, c_out, H, W)


# ----------------------------------------------------------------------------
# Pure-JAX reference for validation
# ----------------------------------------------------------------------------
def _conv_bn_relu_ref(x_nhwc, w_hwio, bias, scale, shift):
    y = lax.conv_general_dilated(
        x_nhwc, w_hwio, window_strides=(1, 1), padding="SAME",
        dimension_numbers=("NHWC", "HWIO", "NHWC"))
    y = y + bias[None, None, None, :]
    y = y * scale[None, None, None, :] + shift[None, None, None, :]
    return jnp.maximum(y, 0.0)


def _forward_ref(params, x_nchw, y_nchw=None):
    x = jnp.transpose(x_nchw, (0, 2, 3, 1))
    p1, p2, p3 = params
    state = _conv_bn_relu_ref(x, p1["w"], p1["b"], p1["scale"], p1["shift"])
    x2_in = state if y_nchw is None else state + jnp.transpose(y_nchw, (0, 2, 3, 1))
    x2 = _conv_bn_relu_ref(x2_in, p2["w"], p2["b"], p2["scale"], p2["shift"])
    state2 = _conv_bn_relu_ref(x2, p3["w"], p3["b"], p3["scale"], p3["shift"])
    return jnp.transpose(x2, (0, 3, 1, 2)), jnp.transpose(state2, (0, 3, 1, 2))


if __name__ == "__main__":
    key = jax.random.PRNGKey(0)
    ch_in, ch_out = 4, 8
    N, H, W = 2, 16, 16

    key, kx, ky = jax.random.split(key, 3)
    x = jax.random.normal(kx, (N, ch_in, H, W), jnp.float32)
    y = jax.random.normal(ky, (N, ch_out, H, W), jnp.float32)

    params = make_params(key, ch_in, ch_out)

    # Pack once at init (hoisted out of the forward path).
    w_all, shift_all = pack_params(params)
    w_all, shift_all = jax.block_until_ready((w_all, shift_all))

    forward = jax.jit(functools.partial(recurr_conv_block_forward, c_out=ch_out))

    # Case 1: y is a tensor -> conv2(state + y)
    x_out, state_out = forward(w_all, shift_all, x, y)
    jax.block_until_ready((x_out, state_out))

    # Case 2: y is None -> conv2(state)
    x_out_n, state_out_n = forward(w_all, shift_all, x, None)
    jax.block_until_ready((x_out_n, state_out_n))

    # Validate against a pure-JAX reference.
    x_ref, s_ref = _forward_ref(params, x, y)
    x_ref_n, s_ref_n = _forward_ref(params, x, None)
    np.testing.assert_allclose(np.asarray(x_out), np.asarray(x_ref), atol=1e-4, rtol=1e-4)
    np.testing.assert_allclose(np.asarray(state_out), np.asarray(s_ref), atol=1e-4, rtol=1e-4)
    np.testing.assert_allclose(np.asarray(x_out_n), np.asarray(x_ref_n), atol=1e-4, rtol=1e-4)
    np.testing.assert_allclose(np.asarray(state_out_n), np.asarray(s_ref_n), atol=1e-4, rtol=1e-4)

    print("KERNEL_OK")
</pallas_src>

<mosaic_0001>
module attributes {stable_mosaic.version = 11 : i64} {
  func.func @_recurr_conv_block_kernel(%arg0: i32, %arg1: memref<2x4x256xf32, #tpu.memory_space<vmem>>, %arg2: memref<2x8x256xf32, #tpu.memory_space<vmem>>, %arg3: memref<3x8x72xf32, #tpu.memory_space<vmem>>, %arg4: memref<3x8x1xf32, #tpu.memory_space<vmem>>, %arg5: memref<2x8x256xf32, #tpu.memory_space<vmem>>, %arg6: memref<2x8x256xf32, #tpu.memory_space<vmem>>, %arg7: memref<72x512xf32, #tpu.memory_space<vmem>>) attributes {dimension_semantics = [#tpu.dimension_semantics<arbitrary>], iteration_bounds = array<i64: 1>, scalar_prefetch = 0 : i64, scratch_operands = 1 : i64, tpu.core_type = #tpu.core_type<tc>, window_params = [{pipeline_mode = #tpu.pipeline_mode<synchronous>, transform_indices = @transform_0, window_bounds = array<i64: 2, 4, 256>}, {pipeline_mode = #tpu.pipeline_mode<synchronous>, transform_indices = @transform_1, window_bounds = array<i64: 2, 8, 256>}, {pipeline_mode = #tpu.pipeline_mode<synchronous>, transform_indices = @transform_2, window_bounds = array<i64: 3, 8, 72>}, {pipeline_mode = #tpu.pipeline_mode<synchronous>, transform_indices = @transform_3, window_bounds = array<i64: 3, 8, 1>}, {pipeline_mode = #tpu.pipeline_mode<synchronous>, transform_indices = @transform_4, window_bounds = array<i64: 2, 8, 256>}, {pipeline_mode = #tpu.pipeline_mode<synchronous>, transform_indices = @transform_5, window_bounds = array<i64: 2, 8, 256>}]} {
    %0 = tpu.iota {dimensions = array<i32: 1>} : vector<1x512xi32>
    %c16_i32 = arith.constant 16 : i32
    %c0_i32 = arith.constant 0 : i32
    %1 = arith.cmpi eq, %c16_i32, %c0_i32 : i32
    %c1_i32 = arith.constant 1 : i32
    %2 = arith.select %1, %c1_i32, %c16_i32 : i32
    %3 = vector.broadcast %2 : i32 to vector<1x512xi32>
    %4 = arith.remsi %0, %3 : vector<1x512xi32>
    %c0_i32_0 = arith.constant 0 : i32
    %5 = vector.broadcast %c0_i32_0 : i32 to vector<1x512xi32>
    %6 = arith.cmpi ne, %4, %5 : vector<1x512xi32>
    %c0_i32_1 = arith.constant 0 : i32
    %7 = vector.broadcast %c0_i32_1 : i32 to vector<1x512xi32>
    %8 = arith.cmpi slt, %4, %7 : vector<1x512xi32>
    %c0_i32_2 = arith.constant 0 : i32
    %9 = arith.cmpi slt, %2, %c0_i32_2 : i32
    %10 = vector.broadcast %9 : i1 to vector<1x512xi1>
    %11 = vector.broadcast %10 : vector<1x512xi1> to vector<1x512xi1>
    %12 = arith.xori %8, %11 : vector<1x512xi1>
    %13 = arith.andi %12, %6 : vector<1x512xi1>
    %14 = vector.broadcast %2 : i32 to vector<1x512xi32>
    %15 = arith.addi %4, %14 : vector<1x512xi32>
    %16 = arith.select %13, %15, %4 : vector<1x512xi1>, vector<1x512xi32>
    %c15_i32 = arith.constant 15 : i32
    %17 = vector.broadcast %c15_i32 : i32 to vector<1x512xi32>
    %18 = arith.cmpi ne, %16, %17 : vector<1x512xi32>
    %c0_i32_3 = arith.constant 0 : i32
    %19 = vector.broadcast %c0_i32_3 : i32 to vector<1x512xi32>
    %20 = arith.cmpi ne, %16, %19 : vector<1x512xi32>
    %cst = arith.constant 0.000000e+00 : f32
    %21 = vector.broadcast %cst : f32 to vector<8x17xf32>
    %c0 = arith.constant 0 : index
    %c0_4 = arith.constant 0 : index
    %c0_5 = arith.constant 0 : index
    %22 = vector.load %arg1[%c0, %c0_4, %c0_5] : memref<2x4x256xf32, #tpu.memory_space<vmem>>, vector<1x4x256xf32>
    %23 = vector.shape_cast %22 : vector<1x4x256xf32> to vector<4x256xf32>
    %cst_6 = arith.constant 0.000000e+00 : f32
    %24 = vector.broadcast %cst_6 : f32 to vector<4x256xf32>
    %25 = tpu.concatenate %23, %24 in 0 : vector<4x256xf32>, vector<4x256xf32> -> vector<8x256xf32>
    %c1 = arith.constant 1 : index
    %c0_7 = arith.constant 0 : index
    %c0_8 = arith.constant 0 : index
    %26 = vector.load %arg1[%c1, %c0_7, %c0_8] : memref<2x4x256xf32, #tpu.memory_space<vmem>>, vector<1x4x256xf32>
    %27 = vector.shape_cast %26 : vector<1x4x256xf32> to vector<4x256xf32>
    %cst_9 = arith.constant 0.000000e+00 : f32
    %28 = vector.broadcast %cst_9 : f32 to vector<4x256xf32>
    %29 = tpu.concatenate %27, %28 in 0 : vector<4x256xf32>, vector<4x256xf32> -> vector<8x256xf32>
    %30 = tpu.concatenate %25, %29 in 1 : vector<8x256xf32>, vector<8x256xf32> -> vector<8x512xf32>
    %cst_10 = arith.constant 0.000000e+00 : f32
    %31 = vector.shape_cast %18 : vector<1x512xi1> to vector<1x512xi1>
    %32 = vector.broadcast %31 : vector<1x512xi1> to vector<8x512xi1>
    %33 = vector.broadcast %cst_10 : f32 to vector<8x512xf32>
    %34 = arith.select %32, %30, %33 : vector<8x512xi1>, vector<8x512xf32>
    %cst_11 = arith.constant 0.000000e+00 : f32
    %35 = vector.shape_cast %20 : vector<1x512xi1> to vector<1x512xi1>
    %36 = vector.broadcast %35 : vector<1x512xi1> to vector<8x512xi1>
    %37 = vector.broadcast %cst_11 : f32 to vector<8x512xf32>
    %38 = arith.select %36, %30, %37 : vector<8x512xi1>, vector<8x512xf32>
    %39 = vector.extract_strided_slice %34 {offsets = [0, 0], sizes = [8, 256], strides = [1, 1]} : vector<8x512xf32> to vector<8x256xf32>
    %40 = tpu.concatenate %21, %39, %21 in 1 : vector<8x17xf32>, vector<8x256xf32>, vector<8x17xf32> -> vector<8x290xf32>
    %41 = vector.extract_strided_slice %30 {offsets = [0, 0], sizes = [8, 256], strides = [1, 1]} : vector<8x512xf32> to vector<8x256xf32>
    %42 = tpu.concatenate %21, %41, %21 in 1 : vector<8x17xf32>, vector<8x256xf32>, vector<8x17xf32> -> vector<8x290xf32>
    %43 = vector.extract_strided_slice %38 {offsets = [0, 0], sizes = [8, 256], strides = [1, 1]} : vector<8x512xf32> to vector<8x256xf32>
    %44 = tpu.concatenate %21, %43, %21 in 1 : vector<8x17xf32>, vector<8x256xf32>, vector<8x17xf32> -> vector<8x290xf32>
    %45 = vector.extract_strided_slice %40 {offsets = [0, 0], sizes = [8, 256], strides = [1, 1]} : vector<8x290xf32> to vector<8x256xf32>
    %c0_12 = arith.constant 0 : index
    %c0_13 = arith.constant 0 : index
    %46 = vector.load %arg7[%c0_12, %c0_13] : memref<72x512xf32, #tpu.memory_space<vmem>>, vector<8x256xf32>
    tpu.vector_store %arg7[%c0_12, %c0_13], %45 {strides = array<i32>} : memref<72x512xf32, #tpu.memory_space<vmem>>, vector<8x256xf32>,
    %47 = vector.extract_strided_slice %42 {offsets = [0, 1], sizes = [8, 256], strides = [1, 1]} : vector<8x290xf32> to vector<8x256xf32>
    %c8 = arith.constant 8 : index
    %c0_14 = arith.constant 0 : index
    %48 = vector.load %arg7[%c8, %c0_14] : memref<72x512xf32, #tpu.memory_space<vmem>>, vector<8x256xf32>
    tpu.vector_store %arg7[%c8, %c0_14], %47 {strides = array<i32>} : memref<72x512xf32, #tpu.memory_space<vmem>>, vector<8x256xf32>,
    %49 = vector.extract_strided_slice %44 {offsets = [0, 2], sizes = [8, 256], strides = [1, 1]} : vector<8x290xf32> to vector<8x256xf32>
    %c16 = arith.constant 16 : index
    %c0_15 = arith.constant 0 : index
    %50 = vector.load %arg7[%c16, %c0_15] : memref<72x512xf32, #tpu.memory_space<vmem>>, vector<8x256xf32>
    tpu.vector_store %arg7[%c16, %c0_15], %49 {strides = array<i32>} : memref<72x512xf32, #tpu.memory_space<vmem>>, vector<8x256xf32>,
    %51 = vector.extract_strided_slice %40 {offsets = [0, 16], sizes = [8, 256], strides = [1, 1]} : vector<8x290xf32> to vector<8x256xf32>
    %c24 = arith.constant 24 : index
    %c0_16 = arith.constant 0 : index
    %52 = vector.load %arg7[%c24, %c0_16] : memref<72x512xf32, #tpu.memory_space<vmem>>, vector<8x256xf32>
    tpu.vector_store %arg7[%c24, %c0_16], %51 {strides = array<i32>} : memref<72x512xf32, #tpu.memory_space<vmem>>, vector<8x256xf32>,
    %53 = vector.extract_strided_slice %42 {offsets = [0, 17], sizes = [8, 256], strides = [1, 1]} : vector<8x290xf32> to vector<8x256xf32>
    %c32 = arith.constant 32 : index
    %c0_17 = arith.constant 0 : index
    %54 = vector.load %arg7[%c32, %c0_17] : memref<72x512xf32, #tpu.memory_space<vmem>>, vector<8x256xf32>
    tpu.vector_store %arg7[%c32, %c0_17], %53 {strides = array<i32>} : memref<72x512xf32, #tpu.memory_space<vmem>>, vector<8x256xf32>,
    %55 = vector.extract_strided_slice %44 {offsets = [0, 18], sizes = [8, 256], strides = [1, 1]} : vector<8x290xf32> to vector<8x256xf32>
    %c40 = arith.constant 40 : index
    %c0_18 = arith.constant 0 : index
    %56 = vector.load %arg7[%c40, %c0_18] : memref<72x512xf32, #tpu.memory_space<vmem>>, vector<8x256xf32>
    tpu.vector_store %arg7[%c40, %c0_18], %55 {strides = array<i32>} : memref<72x512xf32, #tpu.memory_space<vmem>>, vector<8x256xf32>,
    %57 = vector.extract_strided_slice %40 {offsets = [0, 32], sizes = [8, 256], strides = [1, 1]} : vector<8x290xf32> to vector<8x256xf32>
    %c48 = arith.constant 48 : index
    %c0_19 = arith.constant 0 : index
    %58 = vector.load %arg7[%c48, %c0_19] : memref<72x512xf32, #tpu.memory_space<vmem>>, vector<8x256xf32>
    tpu.vector_store %arg7[%c48, %c0_19], %57 {strides = array<i32>} : memref<72x512xf32, #tpu.memory_space<vmem>>, vector<8x256xf32>,
    %59 = vector.extract_strided_slice %42 {offsets = [0, 33], sizes = [8, 256], strides = [1, 1]} : vector<8x290xf32> to vector<8x256xf32>
    %c56 = arith.constant 56 : index
    %c0_20 = arith.constant 0 : index
    %60 = vector.load %arg7[%c56, %c0_20] : memref<72x512xf32, #tpu.memory_space<vmem>>, vector<8x256xf32>
    tpu.vector_store %arg7[%c56, %c0_20], %59 {strides = array<i32>} : memref<72x512xf32, #tpu.memory_space<vmem>>, vector<8x256xf32>,
    %61 = vector.extract_strided_slice %44 {offsets = [0, 34], sizes = [8, 256], strides = [1, 1]} : vector<8x290xf32> to vector<8x256xf32>
    %c64 = arith.constant 64 : index
    %c0_21 = arith.constant 0 : index
    %62 = vector.load %arg7[%c64, %c0_21] : memref<72x512xf32, #tpu.memory_space<vmem>>, vector<8x256xf32>
    tpu.vector_store %arg7[%c64, %c0_21], %61 {strides = array<i32>} : memref<72x512xf32, #tpu.memory_space<vmem>>, vector<8x256xf32>,
    %63 = vector.extract_strided_slice %34 {offsets = [0, 256], sizes = [8, 256], strides = [1, 1]} : vector<8x512xf32> to vector<8x256xf32>
    %64 = tpu.concatenate %21, %63, %21 in 1 : vector<8x17xf32>, vector<8x256xf32>, vector<8x17xf32> -> vector<8x290xf32>
    %65 = vector.extract_strided_slice %30 {offsets = [0, 256], sizes = [8, 256], strides = [1, 1]} : vector<8x512xf32> to vector<8x256xf32>
    %66 = tpu.concatenate %21, %65, %21 in 1 : vector<8x17xf32>, vector<8x256xf32>, vector<8x17xf32> -> vector<8x290xf32>
    %67 = vector.extract_strided_slice %38 {offsets = [0, 256], sizes = [8, 256], strides = [1, 1]} : vector<8x512xf32> to vector<8x256xf32>
    %68 = tpu.concatenate %21, %67, %21 in 1 : vector<8x17xf32>, vector<8x256xf32>, vector<8x17xf32> -> vector<8x290xf32>
    %69 = vector.extract_strided_slice %64 {offsets = [0, 0], sizes = [8, 256], strides = [1, 1]} : vector<8x290xf32> to vector<8x256xf32>
    %c0_22 = arith.constant 0 : index
    %c256 = arith.constant 256 : index
    %70 = vector.load %arg7[%c0_22, %c256] : memref<72x512xf32, #tpu.memory_space<vmem>>, vector<8x256xf32>
    tpu.vector_store %arg7[%c0_22, %c256], %69 {strides = array<i32>} : memref<72x512xf32, #tpu.memory_space<vmem>>, vector<8x256xf32>,
    %71 = vector.extract_strided_slice %66 {offsets = [0, 1], sizes = [8, 256], strides = [1, 1]} : vector<8x290xf32> to vector<8x256xf32>
    %c8_23 = arith.constant 8 : index
    %c256_24 = arith.constant 256 : index
    %72 = vector.load %arg7[%c8_23, %c256_24] : memref<72x512xf32, #tpu.memory_space<vmem>>, vector<8x256xf32>
    tpu.vector_store %arg7[%c8_23, %c256_24], %71 {strides = array<i32>} : memref<72x512xf32, #tpu.memory_space<vmem>>, vector<8x256xf32>,
    %73 = vector.extract_strided_slice %68 {offsets = [0, 2], sizes = [8, 256], strides = [1, 1]} : vector<8x290xf32> to vector<8x256xf32>
    %c16_25 = arith.constant 16 : index
    %c256_26 = arith.constant 256 : index
    %74 = vector.load %arg7[%c16_25, %c256_26] : memref<72x512xf32, #tpu.memory_space<vmem>>, vector<8x256xf32>
    tpu.vector_store %arg7[%c16_25, %c256_26], %73 {strides = array<i32>} : memref<72x512xf32, #tpu.memory_space<vmem>>, vector<8x256xf32>,
    %75 = vector.extract_strided_slice %64 {offsets = [0, 16], sizes = [8, 256], strides = [1, 1]} : vector<8x290xf32> to vector<8x256xf32>
    %c24_27 = arith.constant 24 : index
    %c256_28 = arith.constant 256 : index
    %76 = vector.load %arg7[%c24_27, %c256_28] : memref<72x512xf32, #tpu.memory_space<vmem>>, vector<8x256xf32>
    tpu.vector_store %arg7[%c24_27, %c256_28], %75 {strides = array<i32>} : memref<72x512xf32, #tpu.memory_space<vmem>>, vector<8x256xf32>,
    %77 = vector.extract_strided_slice %66 {offsets = [0, 17], sizes = [8, 256], strides = [1, 1]} : vector<8x290xf32> to vector<8x256xf32>
    %c32_29 = arith.constant 32 : index
    %c256_30 = arith.constant 256 : index
    %78 = vector.load %arg7[%c32_29, %c256_30] : memref<72x512xf32, #tpu.memory_space<vmem>>, vector<8x256xf32>
    tpu.vector_store %arg7[%c32_29, %c256_30], %77 {strides = array<i32>} : memref<72x512xf32, #tpu.memory_space<vmem>>, vector<8x256xf32>,
    %79 = vector.extract_strided_slice %68 {offsets = [0, 18], sizes = [8, 256], strides = [1, 1]} : vector<8x290xf32> to vector<8x256xf32>
    %c40_31 = arith.constant 40 : index
    %c256_32 = arith.constant 256 : index
    %80 = vector.load %arg7[%c40_31, %c256_32] : memref<72x512xf32, #tpu.memory_space<vmem>>, vector<8x256xf32>
    tpu.vector_store %arg7[%c40_31, %c256_32], %79 {strides = array<i32>} : memref<72x512xf32, #tpu.memory_space<vmem>>, vector<8x256xf32>,
    %81 = vector.extract_strided_slice %64 {offsets = [0, 32], sizes = [8, 256], strides = [1, 1]} : vector<8x290xf32> to vector<8x256xf32>
    %c48_33 = arith.constant 48 : index
    %c256_34 = arith.constant 256 : index
    %82 = vector.load %arg7[%c48_33, %c256_34] : memref<72x512xf32, #tpu.memory_space<vmem>>, vector<8x256xf32>
    tpu.vector_store %arg7[%c48_33, %c256_34], %81 {strides = array<i32>} : memref<72x512xf32, #tpu.memory_space<vmem>>, vector<8x256xf32>,
    %83 = vector.extract_strided_slice %66 {offsets = [0, 33], sizes = [8, 256], strides = [1, 1]} : vector<8x290xf32> to vector<8x256xf32>
    %c56_35 = arith.constant 56 : index
    %c256_36 = arith.constant 256 : index
    %84 = vector.load %arg7[%c56_35, %c256_36] : memref<72x512xf32, #tpu.memory_space<vmem>>, vector<8x256xf32>
    tpu.vector_store %arg7[%c56_35, %c256_36], %83 {strides = array<i32>} : memref<72x512xf32, #tpu.memory_space<vmem>>, vector<8x256xf32>,
    %85 = vector.extract_strided_slice %68 {offsets = [0, 34], sizes = [8, 256], strides = [1, 1]} : vector<8x290xf32> to vector<8x256xf32>
    %c64_37 = arith.constant 64 : index
    %c256_38 = arith.constant 256 : index
    %86 = vector.load %arg7[%c64_37, %c256_38] : memref<72x512xf32, #tpu.memory_space<vmem>>, vector<8x256xf32>
    tpu.vector_store %arg7[%c64_37, %c256_38], %85 {strides = array<i32>} : memref<72x512xf32, #tpu.memory_space<vmem>>, vector<8x256xf32>,
    %c0_39 = arith.constant 0 : index
    %c0_40 = arith.constant 0 : index
    %c0_41 = arith.constant 0 : index
    %87 = vector.load %arg3[%c0_39, %c0_40, %c0_41] : memref<3x8x72xf32, #tpu.memory_space<vmem>>, vector<1x8x72xf32>
    %88 = vector.shape_cast %87 : vector<1x8x72xf32> to vector<8x72xf32>
    %c0_42 = arith.constant 0 : index
    %c0_43 = arith.constant 0 : index
    %89 = vector.load %arg7[%c0_42, %c0_43] : memref<72x512xf32, #tpu.memory_space<vmem>>, vector<72x512xf32>
    %cst_44 = arith.constant dense<0.000000e+00> : vector<8x512xf32>
    %90 = tpu.matmul %88, %89, %cst_44 {dimension_numbers = #tpu.dot_dimension_numbers<[1], [0], [0], [1], [0, 0, 1, 1], [], []>} : vector<8x72xf32>, vector<72x512xf32>, vector<8x512xf32> -> vector<8x512xf32>
    %c0_45 = arith.constant 0 : index
    %c0_46 = arith.constant 0 : index
    %c0_47 = arith.constant 0 : index
    %91 = vector.load %arg4[%c0_45, %c0_46, %c0_47] : memref<3x8x1xf32, #tpu.memory_space<vmem>>, vector<1x8x1xf32>
    %92 = vector.shape_cast %91 : vector<1x8x1xf32> to vector<8x1xf32>
    %93 = vector.broadcast %92 : vector<8x1xf32> to vector<8x512xf32>
    %94 = arith.addf %90, %93 : vector<8x512xf32>
    %cst_48 = arith.constant 0.000000e+00 : f32
    %95 = vector.broadcast %cst_48 : f32 to vector<8x512xf32>
    %96 = arith.maximumf %94, %95 : vector<8x512xf32>
    %c0_49 = arith.constant 0 : index
    %c0_50 = arith.constant 0 : index
    %c0_51 = arith.constant 0 : index
    %97 = vector.load %arg2[%c0_49, %c0_50, %c0_51] : memref<2x8x256xf32, #tpu.memory_space<vmem>>, vector<1x8x256xf32>
    %98 = vector.shape_cast %97 : vector<1x8x256xf32> to vector<8x256xf32>
    %c1_52 = arith.constant 1 : index
    %c0_53 = arith.constant 0 : index
    %c0_54 = arith.constant 0 : index
    %99 = vector.load %arg2[%c1_52, %c0_53, %c0_54] : memref<2x8x256xf32, #tpu.memory_space<vmem>>, vector<1x8x256xf32>
    %100 = vector.shape_cast %99 : vector<1x8x256xf32> to vector<8x256xf32>
    %101 = tpu.concatenate %98, %100 in 1 : vector<8x256xf32>, vector<8x256xf32> -> vector<8x512xf32>
    %102 = arith.addf %96, %101 : vector<8x512xf32>
    %cst_55 = arith.constant 0.000000e+00 : f32
    %103 = vector.shape_cast %18 : vector<1x512xi1> to vector<1x512xi1>
    %104 = vector.broadcast %103 : vector<1x512xi1> to vector<8x512xi1>
    %105 = vector.broadcast %cst_55 : f32 to vector<8x512xf32>
    %106 = arith.select %104, %102, %105 : vector<8x512xi1>, vector<8x512xf32>
    %cst_56 = arith.constant 0.000000e+00 : f32
    %107 = vector.shape_cast %20 : vector<1x512xi1> to vector<1x512xi1>
    %108 = vector.broadcast %107 : vector<1x512xi1> to vector<8x512xi1>
    %109 = vector.broadcast %cst_56 : f32 to vector<8x512xf32>
    %110 = arith.select %108, %102, %109 : vector<8x512xi1>, vector<8x512xf32>
    %111 = vector.extract_strided_slice %106 {offsets = [0, 0], sizes = [8, 256], strides = [1, 1]} : vector<8x512xf32> to vector<8x256xf32>
    %112 = tpu.concatenate %21, %111, %21 in 1 : vector<8x17xf32>, vector<8x256xf32>, vector<8x17xf32> -> vector<8x290xf32>
    %113 = vector.extract_strided_slice %102 {offsets = [0, 0], sizes = [8, 256], strides = [1, 1]} : vector<8x512xf32> to vector<8x256xf32>
    %114 = tpu.concatenate %21, %113, %21 in 1 : vector<8x17xf32>, vector<8x256xf32>, vector<8x17xf32> -> vector<8x290xf32>
    %115 = vector.extract_strided_slice %110 {offsets = [0, 0], sizes = [8, 256], strides = [1, 1]} : vector<8x512xf32> to vector<8x256xf32>
    %116 = tpu.concatenate %21, %115, %21 in 1 : vector<8x17xf32>, vector<8x256xf32>, vector<8x17xf32> -> vector<8x290xf32>
    %117 = vector.extract_strided_slice %112 {offsets = [0, 0], sizes = [8, 256], strides = [1, 1]} : vector<8x290xf32> to vector<8x256xf32>
    %c0_57 = arith.constant 0 : index
    %c0_58 = arith.constant 0 : index
    %118 = vector.load %arg7[%c0_57, %c0_58] : memref<72x512xf32, #tpu.memory_space<vmem>>, vector<8x256xf32>
    tpu.vector_store %arg7[%c0_57, %c0_58], %117 {strides = array<i32>} : memref<72x512xf32, #tpu.memory_space<vmem>>, vector<8x256xf32>,
    %119 = vector.extract_strided_slice %114 {offsets = [0, 1], sizes = [8, 256], strides = [1, 1]} : vector<8x290xf32> to vector<8x256xf32>
    %c8_59 = arith.constant 8 : index
    %c0_60 = arith.constant 0 : index
    %120 = vector.load %arg7[%c8_59, %c0_60] : memref<72x512xf32, #tpu.memory_space<vmem>>, vector<8x256xf32>
    tpu.vector_store %arg7[%c8_59, %c0_60], %119 {strides = array<i32>} : memref<72x512xf32, #tpu.memory_space<vmem>>, vector<8x256xf32>,
    %121 = vector.extract_strided_slice %116 {offsets = [0, 2], sizes = [8, 256], strides = [1, 1]} : vector<8x290xf32> to vector<8x256xf32>
    %c16_61 = arith.constant 16 : index
    %c0_62 = arith.constant 0 : index
    %122 = vector.load %arg7[%c16_61, %c0_62] : memref<72x512xf32, #tpu.memory_space<vmem>>, vector<8x256xf32>
    tpu.vector_store %arg7[%c16_61, %c0_62], %121 {strides = array<i32>} : memref<72x512xf32, #tpu.memory_space<vmem>>, vector<8x256xf32>,
    %123 = vector.extract_strided_slice %112 {offsets = [0, 16], sizes = [8, 256], strides = [1, 1]} : vector<8x290xf32> to vector<8x256xf32>
    %c24_63 = arith.constant 24 : index
    %c0_64 = arith.constant 0 : index
    %124 = vector.load %arg7[%c24_63, %c0_64] : memref<72x512xf32, #tpu.memory_space<vmem>>, vector<8x256xf32>
    tpu.vector_store %arg7[%c24_63, %c0_64], %123 {strides = array<i32>} : memref<72x512xf32, #tpu.memory_space<vmem>>, vector<8x256xf32>,
    %125 = vector.extract_strided_slice %114 {offsets = [0, 17], sizes = [8, 256], strides = [1, 1]} : vector<8x290xf32> to vector<8x256xf32>
    %c32_65 = arith.constant 32 : index
    %c0_66 = arith.constant 0 : index
    %126 = vector.load %arg7[%c32_65, %c0_66] : memref<72x512xf32, #tpu.memory_space<vmem>>, vector<8x256xf32>
    tpu.vector_store %arg7[%c32_65, %c0_66], %125 {strides = array<i32>} : memref<72x512xf32, #tpu.memory_space<vmem>>, vector<8x256xf32>,
    %127 = vector.extract_strided_slice %116 {offsets = [0, 18], sizes = [8, 256], strides = [1, 1]} : vector<8x290xf32> to vector<8x256xf32>
    %c40_67 = arith.constant 40 : index
    %c0_68 = arith.constant 0 : index
    %128 = vector.load %arg7[%c40_67, %c0_68] : memref<72x512xf32, #tpu.memory_space<vmem>>, vector<8x256xf32>
    tpu.vector_store %arg7[%c40_67, %c0_68], %127 {strides = array<i32>} : memref<72x512xf32, #tpu.memory_space<vmem>>, vector<8x256xf32>,
    %129 = vector.extract_strided_slice %112 {offsets = [0, 32], sizes = [8, 256], strides = [1, 1]} : vector<8x290xf32> to vector<8x256xf32>
    %c48_69 = arith.constant 48 : index
    %c0_70 = arith.constant 0 : index
    %130 = vector.load %arg7[%c48_69, %c0_70] : memref<72x512xf32, #tpu.memory_space<vmem>>, vector<8x256xf32>
    tpu.vector_store %arg7[%c48_69, %c0_70], %129 {strides = array<i32>} : memref<72x512xf32, #tpu.memory_space<vmem>>, vector<8x256xf32>,
    %131 = vector.extract_strided_slice %114 {offsets = [0, 33], sizes = [8, 256], strides = [1, 1]} : vector<8x290xf32> to vector<8x256xf32>
    %c56_71 = arith.constant 56 : index
    %c0_72 = arith.constant 0 : index
    %132 = vector.load %arg7[%c56_71, %c0_72] : memref<72x512xf32, #tpu.memory_space<vmem>>, vector<8x256xf32>
    tpu.vector_store %arg7[%c56_71, %c0_72], %131 {strides = array<i32>} : memref<72x512xf32, #tpu.memory_space<vmem>>, vector<8x256xf32>,
    %133 = vector.extract_strided_slice %116 {offsets = [0, 34], sizes = [8, 256], strides = [1, 1]} : vector<8x290xf32> to vector<8x256xf32>
    %c64_73 = arith.constant 64 : index
    %c0_74 = arith.constant 0 : index
    %134 = vector.load %arg7[%c64_73, %c0_74] : memref<72x512xf32, #tpu.memory_space<vmem>>, vector<8x256xf32>
    tpu.vector_store %arg7[%c64_73, %c0_74], %133 {strides = array<i32>} : memref<72x512xf32, #tpu.memory_space<vmem>>, vector<8x256xf32>,
    %135 = vector.extract_strided_slice %106 {offsets = [0, 256], sizes = [8, 256], strides = [1, 1]} : vector<8x512xf32> to vector<8x256xf32>
    %136 = tpu.concatenate %21, %135, %21 in 1 : vector<8x17xf32>, vector<8x256xf32>, vector<8x17xf32> -> vector<8x290xf32>
    %137 = vector.extract_strided_slice %102 {offsets = [0, 256], sizes = [8, 256], strides = [1, 1]} : vector<8x512xf32> to vector<8x256xf32>
    %138 = tpu.concatenate %21, %137, %21 in 1 : vector<8x17xf32>, vector<8x256xf32>, vector<8x17xf32> -> vector<8x290xf32>
    %139 = vector.extract_strided_slice %110 {offsets = [0, 256], sizes = [8, 256], strides = [1, 1]} : vector<8x512xf32> to vector<8x256xf32>
    %140 = tpu.concatenate %21, %139, %21 in 1 : vector<8x17xf32>, vector<8x256xf32>, vector<8x17xf32> -> vector<8x290xf32>
    %141 = vector.extract_strided_slice %136 {offsets = [0, 0], sizes = [8, 256], strides = [1, 1]} : vector<8x290xf32> to vector<8x256xf32>
    %c0_75 = arith.constant 0 : index
    %c256_76 = arith.constant 256 : index
    %142 = vector.load %arg7[%c0_75, %c256_76] : memref<72x512xf32, #tpu.memory_space<vmem>>, vector<8x256xf32>
    tpu.vector_store %arg7[%c0_75, %c256_76], %141 {strides = array<i32>} : memref<72x512xf32, #tpu.memory_space<vmem>>, vector<8x256xf32>,
    %143 = vector.extract_strided_slice %138 {offsets = [0, 1], sizes = [8, 256], strides = [1, 1]} : vector<8x290xf32> to vector<8x256xf32>
    %c8_77 = arith.constant 8 : index
    %c256_78 = arith.constant 256 : index
    %144 = vector.load %arg7[%c8_77, %c256_78] : memref<72x512xf32, #tpu.memory_space<vmem>>, vector<8x256xf32>
    tpu.vector_store %arg7[%c8_77, %c256_78], %143 {strides = array<i32>} : memref<72x512xf32, #tpu.memory_space<vmem>>, vector<8x256xf32>,
    %145 = vector.extract_strided_slice %140 {offsets = [0, 2], sizes = [8, 256], strides = [1, 1]} : vector<8x290xf32> to vector<8x256xf32>
    %c16_79 = arith.constant 16 : index
    %c256_80 = arith.constant 256 : index
    %146 = vector.load %arg7[%c16_79, %c256_80] : memref<72x512xf32, #tpu.memory_space<vmem>>, vector<8x256xf32>
    tpu.vector_store %arg7[%c16_79, %c256_80], %145 {strides = array<i32>} : memref<72x512xf32, #tpu.memory_space<vmem>>, vector<8x256xf32>,
    %147 = vector.extract_strided_slice %136 {offsets = [0, 16], sizes = [8, 256], strides = [1, 1]} : vector<8x290xf32> to vector<8x256xf32>
    %c24_81 = arith.constant 24 : index
    %c256_82 = arith.constant 256 : index
    %148 = vector.load %arg7[%c24_81, %c256_82] : memref<72x512xf32, #tpu.memory_space<vmem>>, vector<8x256xf32>
    tpu.vector_store %arg7[%c24_81, %c256_82], %147 {strides = array<i32>} : memref<72x512xf32, #tpu.memory_space<vmem>>, vector<8x256xf32>,
    %149 = vector.extract_strided_slice %138 {offsets = [0, 17], sizes = [8, 256], strides = [1, 1]} : vector<8x290xf32> to vector<8x256xf32>
    %c32_83 = arith.constant 32 : index
    %c256_84 = arith.constant 256 : index
    %150 = vector.load %arg7[%c32_83, %c256_84] : memref<72x512xf32, #tpu.memory_space<vmem>>, vector<8x256xf32>
    tpu.vector_store %arg7[%c32_83, %c256_84], %149 {strides = array<i32>} : memref<72x512xf32, #tpu.memory_space<vmem>>, vector<8x256xf32>,
    %151 = vector.extract_strided_slice %140 {offsets = [0, 18], sizes = [8, 256], strides = [1, 1]} : vector<8x290xf32> to vector<8x256xf32>
    %c40_85 = arith.constant 40 : index
    %c256_86 = arith.constant 256 : index
    %152 = vector.load %arg7[%c40_85, %c256_86] : memref<72x512xf32, #tpu.memory_space<vmem>>, vector<8x256xf32>
    tpu.vector_store %arg7[%c40_85, %c256_86], %151 {strides = array<i32>} : memref<72x512xf32, #tpu.memory_space<vmem>>, vector<8x256xf32>,
    %153 = vector.extract_strided_slice %136 {offsets = [0, 32], sizes = [8, 256], strides = [1, 1]} : vector<8x290xf32> to vector<8x256xf32>
    %c48_87 = arith.constant 48 : index
    %c256_88 = arith.constant 256 : index
    %154 = vector.load %arg7[%c48_87, %c256_88] : memref<72x512xf32, #tpu.memory_space<vmem>>, vector<8x256xf32>
    tpu.vector_store %arg7[%c48_87, %c256_88], %153 {strides = array<i32>} : memref<72x512xf32, #tpu.memory_space<vmem>>, vector<8x256xf32>,
    %155 = vector.extract_strided_slice %138 {offsets = [0, 33], sizes = [8, 256], strides = [1, 1]} : vector<8x290xf32> to vector<8x256xf32>
    %c56_89 = arith.constant 56 : index
    %c256_90 = arith.constant 256 : index
    %156 = vector.load %arg7[%c56_89, %c256_90] : memref<72x512xf32, #tpu.memory_space<vmem>>, vector<8x256xf32>
    tpu.vector_store %arg7[%c56_89, %c256_90], %155 {strides = array<i32>} : memref<72x512xf32, #tpu.memory_space<vmem>>, vector<8x256xf32>,
    %157 = vector.extract_strided_slice %140 {offsets = [0, 34], sizes = [8, 256], strides = [1, 1]} : vector<8x290xf32> to vector<8x256xf32>
    %c64_91 = arith.constant 64 : index
    %c256_92 = arith.constant 256 : index
    %158 = vector.load %arg7[%c64_91, %c256_92] : memref<72x512xf32, #tpu.memory_space<vmem>>, vector<8x256xf32>
    tpu.vector_store %arg7[%c64_91, %c256_92], %157 {strides = array<i32>} : memref<72x512xf32, #tpu.memory_space<vmem>>, vector<8x256xf32>,
    %c1_93 = arith.constant 1 : index
    %c0_94 = arith.constant 0 : index
    %c0_95 = arith.constant 0 : index
    %159 = vector.load %arg3[%c1_93, %c0_94, %c0_95] : memref<3x8x72xf32, #tpu.memory_space<vmem>>, vector<1x8x72xf32>
    %160 = vector.shape_cast %159 : vector<1x8x72xf32> to vector<8x72xf32>
    %c0_96 = arith.constant 0 : index
    %c0_97 = arith.constant 0 : index
    %161 = vector.load %arg7[%c0_96, %c0_97] : memref<72x512xf32, #tpu.memory_space<vmem>>, vector<72x512xf32>
    %cst_98 = arith.constant dense<0.000000e+00> : vector<8x512xf32>
    %162 = tpu.matmul %160, %161, %cst_98 {dimension_numbers = #tpu.dot_dimension_numbers<[1], [0], [0], [1], [0, 0, 1, 1], [], []>} : vector<8x72xf32>, vector<72x512xf32>, vector<8x512xf32> -> vector<8x512xf32>
    %c1_99 = arith.constant 1 : index
    %c0_100 = arith.constant 0 : index
    %c0_101 = arith.constant 0 : index
    %163 = vector.load %arg4[%c1_99, %c0_100, %c0_101] : memref<3x8x1xf32, #tpu.memory_space<vmem>>, vector<1x8x1xf32>
    %164 = vector.shape_cast %163 : vector<1x8x1xf32> to vector<8x1xf32>
    %165 = vector.broadcast %164 : vector<8x1xf32> to vector<8x512xf32>
    %166 = arith.addf %162, %165 : vector<8x512xf32>
    %cst_102 = arith.constant 0.000000e+00 : f32
    %167 = vector.broadcast %cst_102 : f32 to vector<8x512xf32>
    %168 = arith.maximumf %166, %167 : vector<8x512xf32>
    %cst_103 = arith.constant 0.000000e+00 : f32
    %169 = vector.shape_cast %18 : vector<1x512xi1> to vector<1x512xi1>
    %170 = vector.broadcast %169 : vector<1x512xi1> to vector<8x512xi1>
    %171 = vector.broadcast %cst_103 : f32 to vector<8x512xf32>
    %172 = arith.select %170, %168, %171 : vector<8x512xi1>, vector<8x512xf32>
    %cst_104 = arith.constant 0.000000e+00 : f32
    %173 = vector.shape_cast %20 : vector<1x512xi1> to vector<1x512xi1>
    %174 = vector.broadcast %173 : vector<1x512xi1> to vector<8x512xi1>
    %175 = vector.broadcast %cst_104 : f32 to vector<8x512xf32>
    %176 = arith.select %174, %168, %175 : vector<8x512xi1>, vector<8x512xf32>
    %177 = vector.extract_strided_slice %172 {offsets = [0, 0], sizes = [8, 256], strides = [1, 1]} : vector<8x512xf32> to vector<8x256xf32>
    %178 = tpu.concatenate %21, %177, %21 in 1 : vector<8x17xf32>, vector<8x256xf32>, vector<8x17xf32> -> vector<8x290xf32>
    %179 = vector.extract_strided_slice %168 {offsets = [0, 0], sizes = [8, 256], strides = [1, 1]} : vector<8x512xf32> to vector<8x256xf32>
    %180 = tpu.concatenate %21, %179, %21 in 1 : vector<8x17xf32>, vector<8x256xf32>, vector<8x17xf32> -> vector<8x290xf32>
    %181 = vector.extract_strided_slice %176 {offsets = [0, 0], sizes = [8, 256], strides = [1, 1]} : vector<8x512xf32> to vector<8x256xf32>
    %182 = tpu.concatenate %21, %181, %21 in 1 : vector<8x17xf32>, vector<8x256xf32>, vector<8x17xf32> -> vector<8x290xf32>
    %183 = vector.extract_strided_slice %178 {offsets = [0, 0], sizes = [8, 256], strides = [1, 1]} : vector<8x290xf32> to vector<8x256xf32>
    %c0_105 = arith.constant 0 : index
    %c0_106 = arith.constant 0 : index
    %184 = vector.load %arg7[%c0_105, %c0_106] : memref<72x512xf32, #tpu.memory_space<vmem>>, vector<8x256xf32>
    tpu.vector_store %arg7[%c0_105, %c0_106], %183 {strides = array<i32>} : memref<72x512xf32, #tpu.memory_space<vmem>>, vector<8x256xf32>,
    %185 = vector.extract_strided_slice %180 {offsets = [0, 1], sizes = [8, 256], strides = [1, 1]} : vector<8x290xf32> to vector<8x256xf32>
    %c8_107 = arith.constant 8 : index
    %c0_108 = arith.constant 0 : index
    %186 = vector.load %arg7[%c8_107, %c0_108] : memref<72x512xf32, #tpu.memory_space<vmem>>, vector<8x256xf32>
    tpu.vector_store %arg7[%c8_107, %c0_108], %185 {strides = array<i32>} : memref<72x512xf32, #tpu.memory_space<vmem>>, vector<8x256xf32>,
    %187 = vector.extract_strided_slice %182 {offsets = [0, 2], sizes = [8, 256], strides = [1, 1]} : vector<8x290xf32> to vector<8x256xf32>
    %c16_109 = arith.constant 16 : index
    %c0_110 = arith.constant 0 : index
    %188 = vector.load %arg7[%c16_109, %c0_110] : memref<72x512xf32, #tpu.memory_space<vmem>>, vector<8x256xf32>
    tpu.vector_store %arg7[%c16_109, %c0_110], %187 {strides = array<i32>} : memref<72x512xf32, #tpu.memory_space<vmem>>, vector<8x256xf32>,
    %189 = vector.extract_strided_slice %178 {offsets = [0, 16], sizes = [8, 256], strides = [1, 1]} : vector<8x290xf32> to vector<8x256xf32>
    %c24_111 = arith.constant 24 : index
    %c0_112 = arith.constant 0 : index
    %190 = vector.load %arg7[%c24_111, %c0_112] : memref<72x512xf32, #tpu.memory_space<vmem>>, vector<8x256xf32>
    tpu.vector_store %arg7[%c24_111, %c0_112], %189 {strides = array<i32>} : memref<72x512xf32, #tpu.memory_space<vmem>>, vector<8x256xf32>,
    %191 = vector.extract_strided_slice %180 {offsets = [0, 17], sizes = [8, 256], strides = [1, 1]} : vector<8x290xf32> to vector<8x256xf32>
    %c32_113 = arith.constant 32 : index
    %c0_114 = arith.constant 0 : index
    %192 = vector.load %arg7[%c32_113, %c0_114] : memref<72x512xf32, #tpu.memory_space<vmem>>, vector<8x256xf32>
    tpu.vector_store %arg7[%c32_113, %c0_114], %191 {strides = array<i32>} : memref<72x512xf32, #tpu.memory_space<vmem>>, vector<8x256xf32>,
    %193 = vector.extract_strided_slice %182 {offsets = [0, 18], sizes = [8, 256], strides = [1, 1]} : vector<8x290xf32> to vector<8x256xf32>
    %c40_115 = arith.constant 40 : index
    %c0_116 = arith.constant 0 : index
    %194 = vector.load %arg7[%c40_115, %c0_116] : memref<72x512xf32, #tpu.memory_space<vmem>>, vector<8x256xf32>
    tpu.vector_store %arg7[%c40_115, %c0_116], %193 {strides = array<i32>} : memref<72x512xf32, #tpu.memory_space<vmem>>, vector<8x256xf32>,
    %195 = vector.extract_strided_slice %178 {offsets = [0, 32], sizes = [8, 256], strides = [1, 1]} : vector<8x290xf32> to vector<8x256xf32>
    %c48_117 = arith.constant 48 : index
    %c0_118 = arith.constant 0 : index
    %196 = vector.load %arg7[%c48_117, %c0_118] : memref<72x512xf32, #tpu.memory_space<vmem>>, vector<8x256xf32>
    tpu.vector_store %arg7[%c48_117, %c0_118], %195 {strides = array<i32>} : memref<72x512xf32, #tpu.memory_space<vmem>>, vector<8x256xf32>,
    %197 = vector.extract_strided_slice %180 {offsets = [0, 33], sizes = [8, 256], strides = [1, 1]} : vector<8x290xf32> to vector<8x256xf32>
    %c56_119 = arith.constant 56 : index
    %c0_120 = arith.constant 0 : index
    %198 = vector.load %arg7[%c56_119, %c0_120] : memref<72x512xf32, #tpu.memory_space<vmem>>, vector<8x256xf32>
    tpu.vector_store %arg7[%c56_119, %c0_120], %197 {strides = array<i32>} : memref<72x512xf32, #tpu.memory_space<vmem>>, vector<8x256xf32>,
    %199 = vector.extract_strided_slice %182 {offsets = [0, 34], sizes = [8, 256], strides = [1, 1]} : vector<8x290xf32> to vector<8x256xf32>
    %c64_121 = arith.constant 64 : index
    %c0_122 = arith.constant 0 : index
    %200 = vector.load %arg7[%c64_121, %c0_122] : memref<72x512xf32, #tpu.memory_space<vmem>>, vector<8x256xf32>
    tpu.vector_store %arg7[%c64_121, %c0_122], %199 {strides = array<i32>} : memref<72x512xf32, #tpu.memory_space<vmem>>, vector<8x256xf32>,
    %201 = vector.extract_strided_slice %172 {offsets = [0, 256], sizes = [8, 256], strides = [1, 1]} : vector<8x512xf32> to vector<8x256xf32>
    %202 = tpu.concatenate %21, %201, %21 in 1 : vector<8x17xf32>, vector<8x256xf32>, vector<8x17xf32> -> vector<8x290xf32>
    %203 = vector.extract_strided_slice %168 {offsets = [0, 256], sizes = [8, 256], strides = [1, 1]} : vector<8x512xf32> to vector<8x256xf32>
    %204 = tpu.concatenate %21, %203, %21 in 1 : vector<8x17xf32>, vector<8x256xf32>, vector<8x17xf32> -> vector<8x290xf32>
    %205 = vector.extract_strided_slice %176 {offsets = [0, 256], sizes = [8, 256], strides = [1, 1]} : vector<8x512xf32> to vector<8x256xf32>
    %206 = tpu.concatenate %21, %205, %21 in 1 : vector<8x17xf32>, vector<8x256xf32>, vector<8x17xf32> -> vector<8x290xf32>
    %207 = vector.extract_strided_slice %202 {offsets = [0, 0], sizes = [8, 256], strides = [1, 1]} : vector<8x290xf32> to vector<8x256xf32>
    %c0_123 = arith.constant 0 : index
    %c256_124 = arith.constant 256 : index
    %208 = vector.load %arg7[%c0_123, %c256_124] : memref<72x512xf32, #tpu.memory_space<vmem>>, vector<8x256xf32>
    tpu.vector_store %arg7[%c0_123, %c256_124], %207 {strides = array<i32>} : memref<72x512xf32, #tpu.memory_space<vmem>>, vector<8x256xf32>,
    %209 = vector.extract_strided_slice %204 {offsets = [0, 1], sizes = [8, 256], strides = [1, 1]} : vector<8x290xf32> to vector<8x256xf32>
    %c8_125 = arith.constant 8 : index
    %c256_126 = arith.constant 256 : index
    %210 = vector.load %arg7[%c8_125, %c256_126] : memref<72x512xf32, #tpu.memory_space<vmem>>, vector<8x256xf32>
    tpu.vector_store %arg7[%c8_125, %c256_126], %209 {strides = array<i32>} : memref<72x512xf32, #tpu.memory_space<vmem>>, vector<8x256xf32>,
    %211 = vector.extract_strided_slice %206 {offsets = [0, 2], sizes = [8, 256], strides = [1, 1]} : vector<8x290xf32> to vector<8x256xf32>
    %c16_127 = arith.constant 16 : index
    %c256_128 = arith.constant 256 : index
    %212 = vector.load %arg7[%c16_127, %c256_128] : memref<72x512xf32, #tpu.memory_space<vmem>>, vector<8x256xf32>
    tpu.vector_store %arg7[%c16_127, %c256_128], %211 {strides = array<i32>} : memref<72x512xf32, #tpu.memory_space<vmem>>, vector<8x256xf32>,
    %213 = vector.extract_strided_slice %202 {offsets = [0, 16], sizes = [8, 256], strides = [1, 1]} : vector<8x290xf32> to vector<8x256xf32>
    %c24_129 = arith.constant 24 : index
    %c256_130 = arith.constant 256 : index
    %214 = vector.load %arg7[%c24_129, %c256_130] : memref<72x512xf32, #tpu.memory_space<vmem>>, vector<8x256xf32>
    tpu.vector_store %arg7[%c24_129, %c256_130], %213 {strides = array<i32>} : memref<72x512xf32, #tpu.memory_space<vmem>>, vector<8x256xf32>,
    %215 = vector.extract_strided_slice %204 {offsets = [0, 17], sizes = [8, 256], strides = [1, 1]} : vector<8x290xf32> to vector<8x256xf32>
    %c32_131 = arith.constant 32 : index
    %c256_132 = arith.constant 256 : index
    %216 = vector.load %arg7[%c32_131, %c256_132] : memref<72x512xf32, #tpu.memory_space<vmem>>, vector<8x256xf32>
    tpu.vector_store %arg7[%c32_131, %c256_132], %215 {strides = array<i32>} : memref<72x512xf32, #tpu.memory_space<vmem>>, vector<8x256xf32>,
    %217 = vector.extract_strided_slice %206 {offsets = [0, 18], sizes = [8, 256], strides = [1, 1]} : vector<8x290xf32> to vector<8x256xf32>
    %c40_133 = arith.constant 40 : index
    %c256_134 = arith.constant 256 : index
    %218 = vector.load %arg7[%c40_133, %c256_134] : memref<72x512xf32, #tpu.memory_space<vmem>>, vector<8x256xf32>
    tpu.vector_store %arg7[%c40_133, %c256_134], %217 {strides = array<i32>} : memref<72x512xf32, #tpu.memory_space<vmem>>, vector<8x256xf32>,
    %219 = vector.extract_strided_slice %202 {offsets = [0, 32], sizes = [8, 256], strides = [1, 1]} : vector<8x290xf32> to vector<8x256xf32>
    %c48_135 = arith.constant 48 : index
    %c256_136 = arith.constant 256 : index
    %220 = vector.load %arg7[%c48_135, %c256_136] : memref<72x512xf32, #tpu.memory_space<vmem>>, vector<8x256xf32>
    tpu.vector_store %arg7[%c48_135, %c256_136], %219 {strides = array<i32>} : memref<72x512xf32, #tpu.memory_space<vmem>>, vector<8x256xf32>,
    %221 = vector.extract_strided_slice %204 {offsets = [0, 33], sizes = [8, 256], strides = [1, 1]} : vector<8x290xf32> to vector<8x256xf32>
    %c56_137 = arith.constant 56 : index
    %c256_138 = arith.constant 256 : index
    %222 = vector.load %arg7[%c56_137, %c256_138] : memref<72x512xf32, #tpu.memory_space<vmem>>, vector<8x256xf32>
    tpu.vector_store %arg7[%c56_137, %c256_138], %221 {strides = array<i32>} : memref<72x512xf32, #tpu.memory_space<vmem>>, vector<8x256xf32>,
    %223 = vector.extract_strided_slice %206 {offsets = [0, 34], sizes = [8, 256], strides = [1, 1]} : vector<8x290xf32> to vector<8x256xf32>
    %c64_139 = arith.constant 64 : index
    %c256_140 = arith.constant 256 : index
    %224 = vector.load %arg7[%c64_139, %c256_140] : memref<72x512xf32, #tpu.memory_space<vmem>>, vector<8x256xf32>
    tpu.vector_store %arg7[%c64_139, %c256_140], %223 {strides = array<i32>} : memref<72x512xf32, #tpu.memory_space<vmem>>, vector<8x256xf32>,
    %c2 = arith.constant 2 : index
    %c0_141 = arith.constant 0 : index
    %c0_142 = arith.constant 0 : index
    %225 = vector.load %arg3[%c2, %c0_141, %c0_142] : memref<3x8x72xf32, #tpu.memory_space<vmem>>, vector<1x8x72xf32>
    %226 = vector.shape_cast %225 : vector<1x8x72xf32> to vector<8x72xf32>
    %c0_143 = arith.constant 0 : index
    %c0_144 = arith.constant 0 : index
    %227 = vector.load %arg7[%c0_143, %c0_144] : memref<72x512xf32, #tpu.memory_space<vmem>>, vector<72x512xf32>
    %cst_145 = arith.constant dense<0.000000e+00> : vector<8x512xf32>
    %228 = tpu.matmul %226, %227, %cst_145 {dimension_numbers = #tpu.dot_dimension_numbers<[1], [0], [0], [1], [0, 0, 1, 1], [], []>} : vector<8x72xf32>, vector<72x512xf32>, vector<8x512xf32> -> vector<8x512xf32>
    %c2_146 = arith.constant 2 : index
    %c0_147 = arith.constant 0 : index
    %c0_148 = arith.constant 0 : index
    %229 = vector.load %arg4[%c2_146, %c0_147, %c0_148] : memref<3x8x1xf32, #tpu.memory_space<vmem>>, vector<1x8x1xf32>
    %230 = vector.shape_cast %229 : vector<1x8x1xf32> to vector<8x1xf32>
    %231 = vector.broadcast %230 : vector<8x1xf32> to vector<8x512xf32>
    %232 = arith.addf %228, %231 : vector<8x512xf32>
    %cst_149 = arith.constant 0.000000e+00 : f32
    %233 = vector.broadcast %cst_149 : f32 to vector<8x512xf32>
    %234 = arith.maximumf %232, %233 : vector<8x512xf32>
    %235 = vector.extract_strided_slice %168 {offsets = [0, 0], sizes = [8, 256], strides = [1, 1]} : vector<8x512xf32> to vector<8x256xf32>
    %c0_150 = arith.constant 0 : index
    %c0_151 = arith.constant 0 : index
    %c0_152 = arith.constant 0 : index
    %236 = vector.load %arg5[%c0_150, %c0_151, %c0_152] : memref<2x8x256xf32, #tpu.memory_space<vmem>>, vector<1x8x256xf32>
    %237 = vector.shape_cast %236 : vector<1x8x256xf32> to vector<8x256xf32>
    %238 = vector.shape_cast %235 : vector<8x256xf32> to vector<1x8x256xf32>
    tpu.vector_store %arg5[%c0_150, %c0_151, %c0_152], %238 {strides = array<i32>} : memref<2x8x256xf32, #tpu.memory_space<vmem>>, vector<1x8x256xf32>,
    %239 = vector.extract_strided_slice %234 {offsets = [0, 0], sizes = [8, 256], strides = [1, 1]} : vector<8x512xf32> to vector<8x256xf32>
    %c0_153 = arith.constant 0 : index
    %c0_154 = arith.constant 0 : index
    %c0_155 = arith.constant 0 : index
    %240 = vector.load %arg6[%c0_153, %c0_154, %c0_155] : memref<2x8x256xf32, #tpu.memory_space<vmem>>, vector<1x8x256xf32>
    %241 = vector.shape_cast %240 : vector<1x8x256xf32> to vector<8x256xf32>
    %242 = vector.shape_cast %239 : vector<8x256xf32> to vector<1x8x256xf32>
    tpu.vector_store %arg6[%c0_153, %c0_154, %c0_155], %242 {strides = array<i32>} : memref<2x8x256xf32, #tpu.memory_space<vmem>>, vector<1x8x256xf32>,
    %243 = vector.extract_strided_slice %168 {offsets = [0, 256], sizes = [8, 256], strides = [1, 1]} : vector<8x512xf32> to vector<8x256xf32>
    %c1_156 = arith.constant 1 : index
    %c0_157 = arith.constant 0 : index
    %c0_158 = arith.constant 0 : index
    %244 = vector.load %arg5[%c1_156, %c0_157, %c0_158] : memref<2x8x256xf32, #tpu.memory_space<vmem>>, vector<1x8x256xf32>
    %245 = vector.shape_cast %244 : vector<1x8x256xf32> to vector<8x256xf32>
    %246 = vector.shape_cast %243 : vector<8x256xf32> to vector<1x8x256xf32>
    tpu.vector_store %arg5[%c1_156, %c0_157, %c0_158], %246 {strides = array<i32>} : memref<2x8x256xf32, #tpu.memory_space<vmem>>, vector<1x8x256xf32>,
    %247 = vector.extract_strided_slice %234 {offsets = [0, 256], sizes = [8, 256], strides = [1, 1]} : vector<8x512xf32> to vector<8x256xf32>
    %c1_159 = arith.constant 1 : index
    %c0_160 = arith.constant 0 : index
    %c0_161 = arith.constant 0 : index
    %248 = vector.load %arg6[%c1_159, %c0_160, %c0_161] : memref<2x8x256xf32, #tpu.memory_space<vmem>>, vector<1x8x256xf32>
    %249 = vector.shape_cast %248 : vector<1x8x256xf32> to vector<8x256xf32>
    %250 = vector.shape_cast %247 : vector<8x256xf32> to vector<1x8x256xf32>
    tpu.vector_store %arg6[%c1_159, %c0_160, %c0_161], %250 {strides = array<i32>} : memref<2x8x256xf32, #tpu.memory_space<vmem>>, vector<1x8x256xf32>,
    return
  }
  func.func @transform_0(%arg0: i32) -> (i32, i32, i32) {
    %c0_i32 = arith.constant 0 : i32
    %c0_i32_0 = arith.constant 0 : i32
    %c0_i32_1 = arith.constant 0 : i32
    %c0_i32_2 = arith.constant 0 : i32
    return %c0_i32, %c0_i32_0, %c0_i32_1 : i32, i32, i32
  }
  func.func @transform_1(%arg0: i32) -> (i32, i32, i32) {
    %c0_i32 = arith.constant 0 : i32
    %c0_i32_0 = arith.constant 0 : i32
    %c0_i32_1 = arith.constant 0 : i32
    %c0_i32_2 = arith.constant 0 : i32
    return %c0_i32, %c0_i32_0, %c0_i32_1 : i32, i32, i32
  }
  func.func @transform_2(%arg0: i32) -> (i32, i32, i32) {
    %c0_i32 = arith.constant 0 : i32
    %c0_i32_0 = arith.constant 0 : i32
    %c0_i32_1 = arith.constant 0 : i32
    %c0_i32_2 = arith.constant 0 : i32
    return %c0_i32, %c0_i32_0, %c0_i32_1 : i32, i32, i32
  }
  func.func @transform_3(%arg0: i32) -> (i32, i32, i32) {
    %c0_i32 = arith.constant 0 : i32
    %c0_i32_0 = arith.constant 0 : i32
    %c0_i32_1 = arith.constant 0 : i32
    %c0_i32_2 = arith.constant 0 : i32
    return %c0_i32, %c0_i32_0, %c0_i32_1 : i32, i32, i32
  }
  func.func @transform_4(%arg0: i32) -> (i32, i32, i32) {
    %c0_i32 = arith.constant 0 : i32
    %c0_i32_0 = arith.constant 0 : i32
    %c0_i32_1 = arith.constant 0 : i32
    %c0_i32_2 = arith.constant 0 : i32
    return %c0_i32, %c0_i32_0, %c0_i32_1 : i32, i32, i32
  }
  func.func @transform_5(%arg0: i32) -> (i32, i32, i32) {
    %c0_i32 = arith.constant 0 : i32
    %c0_i32_0 = arith.constant 0 : i32
    %c0_i32_1 = arith.constant 0 : i32
    %c0_i32_2 = arith.constant 0 : i32
    return %c0_i32, %c0_i32_0, %c0_i32_1 : i32, i32, i32
  }
}

</mosaic_0001>

<bundles_post_ra>
// kernel: recurr_conv_block_forward.1
= control target key start
LH: loop header
LB: loop body
LE: loop exit
PB: predicated region body
PF: predicated region fallthrough
CT: control target
= control target key end

     0   :  { %vm84_vm0 = vcmask 1043456   ;;  %v19_v0 = vlaneseq  ;;  %s2101_s22 = smov 17   ;;  %vm2695_vm9 = vcmask 138240   ;;  %s2103_s23 = smov 111   ;;  %vm2694_vm10 = vcmask 1039360   ;;  %s2685_s0 = inlined_call_operand.vmem [shape: f32[2,4,256], index: 0, kind: input, shape index: {}]   ;;  %s2686_s3 = inlined_call_operand.vmem [shape: f32[3,8,1], index: 3, kind: input, shape index: {}]   ;;  %s2687_s2 = inlined_call_operand.vmem [shape: f32[3,8,72], index: 2, kind: input, shape index: {}]   ;;  %s2688_s1 = inlined_call_operand.vmem [shape: f32[2,8,256], index: 1, kind: input, shape index: {}]   ;;  %s2689_s4 = inlined_call_operand.vmem [shape: f32[2,8,256], index: 4, kind: output, shape index: {0}]   ;;  %s2690_s5 = inlined_call_operand.vmem [shape: f32[2,8,256], index: 5, kind: output, shape index: {1}]  }
   0x1   :  { %v80_v1 = vld [vmem:[%s2685_s0] sm:$0xff]  ;;  %v1579_v2 = vld [vmem:[%s2685_s0 + $0x8] sm:$0xff]  ;;  %s2102_s0 = smov 127   ;;  %s2104_s24 = smov 95   ;;  %vm1596_vm11 = vmneg %vm2695_vm9  ;;  %vm2112_vm12 = vmmov 1   ;;  %vm2696_vm14 = vcmask 1031168  }
   0x2   :  { %v82_v3 = vcombine.high %v80_v1, %v80_v1  ;;  %v85_v4 = vsel %vm84_vm0, %v80_v1, 0.0  ;;  %v90_v5 = vcombine.high %v1579_v2, %v1579_v2  ;;  %v20_v6 = vand.u32 127, %v19_v0  ;;  %s2105_s25 = smov 126   ;;  %s2106_s26 = smov 112   ;;  %vm2275_vm13 = vmpackc.low %vm2112_vm12, %vm1596_vm11 }
   0x3   :  { %v92_v8 = vsel %vm84_vm0, %v1579_v2, 0.0  ;;  %s2107_s27 = smov 96   ;;  %s2108_s28 = smov 110   ;;  %vm2691_vm15 = vcmask 916480   ;;  %vm2692_vm11 = vcmask 900096   ;;  %vm245_vm12 = vcmask 777216  }
   0x4   :  { %v86_v7 = vsel %vm84_vm0, %v82_v3, 0.0  ;;  %v93_v9 = vsel %vm84_vm0, %v90_v5, 0.0  ;;  %v28_v11 = vand.u32 15, %v20_v6  ;;  %v21_v12 = vadd.s32 128, %v20_v6  ;;  %s2109_s29 = smov 94  }
   0x5   :  { %v1722_v10 = vpack.i.bf16 %v86_v7, %v85_v4  ;;  %v22_v13 = vadd.s32 256, %v20_v6  ;;  %v23_v14 = vadd.s32 384, %v20_v6  ;;  %v1727_v15 = vpack.i.bf16 %v93_v9, %v92_v8 }
   0x6   :  { %vm2150_vm1 = vcmp.ne.s32.totalorder %v28_v11, 15  ;;  %vm2154_vm2 = vcmp.ne.s32.totalorder %v28_v11, 0  ;;  %v35_v18 = vand.u32 15, %v21_v12  ;;  %vm206_vm0 = vcmask 908288  }
   0x7   :  { %1723 = vrot.lane.b32.xlu0 %v1722_v10, %s2101_s22  ;;  %v114_v19 = vsel %vm2154_vm2, %v85_v4, 0.0  ;;  %v42_v20 = vand.u32 15, %v22_v13  ;;  %v102_v21 = vsel %vm2150_vm1, %v85_v4, 0.0  ;;  %v49_v22 = vand.u32 15, %v23_v14 }
   0x8   :  { %144 = vrot.lane.b32.xlu1 %v114_v19, %s2101_s22  ;;  %vm2163_vm3 = vcmp.ne.s32.totalorder %v35_v18, 0  ;;  %vm2167_vm4 = vcmp.ne.s32.totalorder %v35_v18, 15  ;;  %v2110_v18 = vmov 0.0   ;;  %v2111_v19 = vmov 0  }
   0x9   :  { %v103_v25 = vsel %vm2167_vm4, %v86_v7, 0.0  ;;  %vm2173_vm5 = vcmp.ne.s32.totalorder %v42_v20, 15  ;;  %vm2178_vm6 = vcmp.ne.s32.totalorder %v49_v22, 15  ;;  %v115_v30 = vsel %vm2163_vm3, %v86_v7, 0.0  ;;  %514 = vmatprep.mubr.f32.mxu0 %v2110_v18  ;;  %585 = vmatprep.mubr.f32.mxu1 %v2110_v18 }
   0xa   :  { %v1732_v27 = vpack.i.bf16 %v103_v25, %v102_v21  ;;  %v104_v29 = vsel %vm2173_vm5, %v92_v8, 0.0  ;;  %v105_v31 = vsel %vm2178_vm6, %v93_v9, 0.0  ;;  %vm2188_vm7 = vcmp.ne.s32.totalorder %v42_v20, 0  ;;  %1847 = vset.pattern.permute.xlu1 %v2111_v19  ;;  %2098 = vset.pattern.permute.xlu0 %v2111_v19  ;;  %v440_v20 = vld [vmem:[%s2686_s3] sm:$0xff] }
   0xb   :  { %1728 = vrot.lane.b32.xlu0 %v1727_v15, %s2101_s22  ;;  %v1737_v33 = vpack.i.bf16 %v105_v31, %v104_v29  ;;  %vm2194_vm8 = vcmp.ne.s32.totalorder %v49_v22, 0  ;;  %v116_v35 = vsel %vm2188_vm7, %v92_v8, 0.0 }
   0xc   :  { %1733 = vrot.lane.b32.xlu1 %v1732_v27, %s2101_s22  ;;  %v117_v36 = vsel %vm2194_vm8, %v93_v9, 0.0 }
   0xf   :  { %146 = vrot.lane.b32.xlu0 %v115_v30, %s2101_s22 }
  0x10   :  { %1738 = vrot.lane.b32.xlu1 %v1737_v33, %s2101_s22 }
  0x13   :  { %290 = vrot.lane.b32.xlu0 %v116_v35, %s2101_s22 }
  0x14   :  { %292 = vrot.lane.b32.xlu1 %v117_v36, %s2101_s22 }
  0x79   :  { %v1724_v37 = vpop.permute.xlu0 %1723 }
  0x7a   :  { %v145_v38 = vpop.permute.xlu1 %144  ;;  %v1725_v39 = vunpack.i.l.bf16 %v1724_v37  ;;  %v1726_v47 = vunpack.i.h.bf16 %v1724_v37 }
  0x7b   :  { %v151_v7 = vsel %vm2695_vm9, 0.0, %v145_v38 }
  0x7c   :  { %v140_v43 = vsel %vm2695_vm9, 0.0, %v1725_v39  ;;  %v141_v51 = vsel %vm2695_vm9, %v1726_v47, 0.0  ;;  %v137_v52 = vsel %vm2695_vm9, %v1725_v39, %v1726_v47 }
  0x7d   :  { %v1729_v40 = vpop.permute.xlu0 %1728  ;;  %v1757_v55 = vpack.i.bf16 %v141_v51, %v137_v52 }
  0x7e   :  { %v1731_v41 = vunpack.i.h.bf16 %v1729_v40  ;;  %v1730_v42 = vunpack.i.l.bf16 %v1729_v40  ;;  %v1734_v46 = vpop.permute.xlu1 %1733 }
  0x7f   :  { %v1736_v59 = vunpack.i.h.bf16 %v1734_v46  ;;  %v2219_v60 = vunpack.i.l.bf16 %v1734_v46 }
  0x80   :  { %v286_v44 = vsel %vm2695_vm9, 0.0, %v1730_v42  ;;  %v287_v48 = vsel %vm2695_vm9, %v1731_v41, 0.0  ;;  %v283_v49 = vsel %vm2695_vm9, %v1730_v42, %v1731_v41 }
  0x81   :  { %v1742_v45 = vpack.i.bf16 %v286_v44, %v140_v43  ;;  %v1762_v50 = vpack.i.bf16 %v287_v48, %v283_v49  ;;  %v147_v54 = vpop.permute.xlu0 %146  ;;  %v2227_v2 = vsel %vm2695_vm9, %v2219_v60, %v1736_v59  ;;  %v130_v3 = vsel %vm2695_vm9, %v1736_v59, 0.0 }
  0x82   :  { %v1739_v53 = vpop.permute.xlu1 %1738  ;;  %v148_v57 = vsel %vm2695_vm9, %v145_v38, %v147_v54  ;;  %v152_v58 = vsel %vm2695_vm9, %v147_v54, 0.0  ;;  %v1792_v6 = vpack.i.bf16 %v130_v3, %v2227_v2  ;;  %v129_v13 = vsel %vm2695_vm9, 0.0, %v2219_v60 }
  0x83   :  { %1743 = vrot.lane.b32.xlu0 %v1742_v45, %s2102_s0  ;;  %1748 = vrot.lane.b32.xlu1 %v1742_v45, %s2103_s23  ;;  %v1787_v0 = vpack.i.bf16 %v152_v58, %v148_v57  ;;  %v1741_v1 = vunpack.i.h.bf16 %v1739_v53  ;;  %v2232_v5 = vunpack.i.l.bf16 %v1739_v53 }
  0x85   :  { %v291_v61 = vpop.permute.xlu0 %290  ;;  %v271_v9 = vsel %vm2695_vm9, %v2232_v5, %v1741_v1  ;;  %v276_v10 = vsel %vm2695_vm9, %v1741_v1, 0.0  ;;  %v275_v14 = vsel %vm2695_vm9, 0.0, %v2232_v5 }
  0x86   :  { %v293_v56 = vpop.permute.xlu1 %292  ;;  %v297_v8 = vsel %vm2695_vm9, 0.0, %v291_v61  ;;  %v1802_v12 = vpack.i.bf16 %v276_v10, %v271_v9  ;;  %v1812_v15 = vpack.i.bf16 %v275_v14, %v129_v13 }
  0x87   :  { %1753 = vrot.lane.b32.xlu0 %v1742_v45, %s2104_s24  ;;  %1763 = vrot.lane.b32.xlu1 %v1762_v50, %s2102_s0  ;;  %v294_v62 = vsel %vm2695_vm9, %v291_v61, %v293_v56  ;;  %v298_v63 = vsel %vm2695_vm9, %v293_v56, 0.0  ;;  %v1807_v11 = vpack.i.bf16 %v297_v8, %v151_v7 }
  0x88   :  { %v1797_v4 = vpack.i.bf16 %v298_v63, %v294_v62 }
  0x8b   :  { %1758 = vrot.lane.b32.xlu0 %v1757_v55, %s2102_s0  ;;  %1768 = vrot.lane.b32.xlu1 %v1757_v55, %s2103_s23 }
  0x8f   :  { %1778 = vrot.lane.b32.xlu0 %v1757_v55, %s2104_s24  ;;  %1773 = vrot.lane.b32.xlu1 %v1762_v50, %s2103_s23 }
  0x93   :  { %1783 = vrot.lane.b32.xlu0 %v1762_v50, %s2104_s24  ;;  %1788 = vrot.lane.b32.xlu1 %v1787_v0, %s2105_s25 }
  0x97   :  { %1798 = vrot.lane.b32.xlu1 %v1797_v4, %s2105_s25  ;;  %1793 = vrot.lane.b32.xlu0 %v1792_v6, %s2106_s26 }
  0x9b   :  { %1808 = vrot.lane.b32.xlu1 %v1807_v11, %s2105_s25  ;;  %1803 = vrot.lane.b32.xlu0 %v1802_v12, %s2106_s26 }
  0x9f   :  { %1833 = vrot.lane.b32.xlu1 %v1792_v6, %s2107_s27  ;;  %1813 = vrot.lane.b32.xlu0 %v1812_v15, %s2106_s26 }
  0xa3   :  { %1838 = vrot.lane.b32.xlu1 %v1802_v12, %s2107_s27  ;;  %1818 = vrot.lane.b32.xlu0 %v1787_v0, %s2108_s28 }
  0xa7   :  { %1843 = vrot.lane.b32.xlu1 %v1812_v15, %s2107_s27  ;;  %1823 = vrot.lane.b32.xlu0 %v1797_v4, %s2108_s28 }
  0xab   :  { %254 = vrot.lane.b32.xlu1 %v148_v57, %s2109_s29  ;;  %1828 = vrot.lane.b32.xlu0 %v1807_v11, %s2108_s28 }
  0xaf   :  { %393 = vrot.lane.b32.xlu1 %v294_v62, %s2109_s29  ;;  %256 = vrot.lane.b32.xlu0 %v152_v58, %s2109_s29 }
  0xb3   :  { %252 = vrot.lane.b32.xlu1 %v151_v7, %s2109_s29  ;;  %395 = vrot.lane.b32.xlu0 %v298_v63, %s2109_s29 }
  0xb7   :  { %391 = vrot.lane.b32.xlu0 %v297_v8, %s2109_s29  ;;  %443 = vperm.xlu1 %1847, %v440_v20  }
  0xf5   :  { %v1744_v21 = vpop.permute.xlu0 %1743  ;;  %v2266_v22 = vpop.permute.xlu1 %1748 }
  0xf6   :  { %v1746_v29 = vunpack.i.h.bf16 %v1744_v21  ;;  %v1745_v41 = vunpack.i.l.bf16 %v1744_v21 }
  0xf9   :  { %v2268_v25 = vpop.permute.xlu0 %1753  ;;  %v1764_v27 = vpop.permute.xlu1 %1763 }
  0xfa   :  { %v1766_v30 = vunpack.i.h.bf16 %v1764_v27  ;;  %v1765_v31 = vunpack.i.l.bf16 %v1764_v27 }
  0xfc   :  { %v310_v33 = vsel %vm2694_vm10, %v1765_v31, %v1766_v30  ;;  %v309_v35 = vsel %vm2694_vm10, %v1746_v29, %v1765_v31 }
  0xfd   :  { %v1759_v36 = vpop.permute.xlu0 %1758  ;;  %v2273_v37 = vpop.permute.xlu1 %1768  ;;  %v1625_v38 = vpack.c.bf16 %v310_v33, %v271_v9  ;;  %v1627_v40 = vpack.c.bf16 %v309_v35, %v2232_v5 }
  0xfe   :  { %v1761_v42 = vunpack.i.h.bf16 %v1759_v36  ;;  %v1760_v43 = vunpack.i.l.bf16 %v1759_v36  ;;  %v1771_v12 = vunpack.i.h.bf16 %v2273_v37  ;;  %v1770_v13 = vunpack.i.l.bf16 %v2273_v37 }
  0xff   :  { %1626 = vmatprep.subr.bf16.mxu1 %v1625_v38 }
 0x100   :  { %1629 = vmatpush1.bf16.msk.msra.mxu1 %vm2275_vm13, %v1627_v40  ;;  %v165_v44 = vsel %vm2694_vm10, %v1760_v43, %v1761_v42  ;;  %v164_v45 = vsel %vm2694_vm10, %v1745_v41, %v1760_v43  ;;  %v208_v37 = vsel %vm206_vm0, %v1770_v13, %v1771_v12  ;;  %v1751_v43 = vunpack.i.h.bf16 %v2266_v22 }
 0x101   :  { %v2284_v46 = vpop.permute.xlu0 %1778  ;;  %v2286_v47 = vpop.permute.xlu1 %1773  ;;  %v1608_v48 = vpack.c.bf16 %v165_v44, %v2227_v2  ;;  %v1610_v49 = vpack.c.bf16 %v164_v45, %v2219_v60 }
 0x102   :  { %v1776_v35 = vunpack.i.h.bf16 %v2286_v47  ;;  %v1775_v36 = vunpack.i.l.bf16 %v2286_v47  ;;  %v1750_v47 = vunpack.i.l.bf16 %v2266_v22  ;;  %v1756_v22 = vunpack.i.h.bf16 %v2268_v25 }
 0x103   :  { %1609 = vmatprep.subr.bf16.mxu0 %v1608_v48 }
 0x104   :  { %1612 = vmatpush1.bf16.msk.msra.mxu0 %vm2275_vm13, %v1610_v49 }
 0x105   :  { %v2292_v50 = vpop.permute.xlu0 %1783  ;;  %v1789_v51 = vpop.permute.xlu1 %1788 }
 0x106   :  { %v1791_v52 = vunpack.i.h.bf16 %v1789_v51  ;;  %v1790_v53 = vunpack.i.l.bf16 %v1789_v51 }
 0x108   :  { %v180_v61 = vsel %vm2696_vm14, %v1790_v53, %v1791_v52 }
 0x109   :  { %v1799_v54 = vpop.permute.xlu1 %1798  ;;  %v1794_v55 = vpop.permute.xlu0 %1793 }
 0x10a   :  { %v1801_v56 = vunpack.i.h.bf16 %v1799_v54  ;;  %v1800_v57 = vunpack.i.l.bf16 %v1799_v54  ;;  %v1796_v58 = vunpack.i.h.bf16 %v1794_v55  ;;  %v1795_v59 = vunpack.i.l.bf16 %v1794_v55 }
 0x10b   :  { %v350_v54 = vsel %vm206_vm0, %v1775_v36, %v1776_v35 }
 0x10c   :  { %v195_v60 = vsel %vm2691_vm15, %v1795_v59, %v1796_v58  ;;  %v324_v3 = vsel %vm2696_vm14, %v1800_v57, %v1801_v56  ;;  %v1780_v56 = vunpack.i.l.bf16 %v2284_v46  ;;  %v1785_v58 = vunpack.i.l.bf16 %v2292_v50 }
 0x10d   :  { %v1809_v62 = vpop.permute.xlu1 %1808  ;;  %v1804_v63 = vpop.permute.xlu0 %1803  ;;  %v1613_v0 = vpack.c.bf16 %v195_v60, %v180_v61 }
 0x10e   :  { %v1806_v1 = vunpack.i.h.bf16 %v1804_v63  ;;  %v1805_v2 = vunpack.i.l.bf16 %v1804_v63  ;;  %v1811_v4 = vunpack.i.h.bf16 %v1809_v62  ;;  %v1810_v5 = vunpack.i.l.bf16 %v1809_v62 }
 0x10f   :  { %1614 = vmatprep.subr.bf16.mxu0 %v1613_v0 }
 0x110   :  { %v338_v6 = vsel %vm2691_vm15, %v1805_v2, %v1806_v1  ;;  %v179_v14 = vsel %vm2696_vm14, %v1810_v5, %v1790_v53  ;;  %v323_v19 = vsel %vm2696_vm14, %v1811_v4, %v1800_v57  ;;  %v1781_v53 = vunpack.i.h.bf16 %v2284_v46 }
 0x111   :  { %v2298_v7 = vpop.permute.xlu1 %1833  ;;  %v1814_v8 = vpop.permute.xlu0 %1813  ;;  %v1630_v9 = vpack.c.bf16 %v338_v6, %v324_v3  ;;  %v1786_v57 = vunpack.i.h.bf16 %v2292_v50  ;;  %v207_v4 = vsel %vm206_vm0, %v1750_v47, %v1770_v13  ;;  %v349_v5 = vsel %vm206_vm0, %v1751_v43, %v1775_v36  ;;  %v403_v36 = vld [vmem:[%s2687_s2] sm:$0xff] }
 0x112   :  { %v1816_v10 = vunpack.i.h.bf16 %v1814_v8  ;;  %v1815_v11 = vunpack.i.l.bf16 %v1814_v8  ;;  %v1836_v48 = vunpack.i.h.bf16 %v2298_v7  ;;  %v1835_v49 = vunpack.i.l.bf16 %v2298_v7 }
 0x113   :  { %1631 = vmatprep.subr.bf16.mxu1 %v1630_v9 }
 0x114   :  { %v194_v15 = vsel %vm2691_vm15, %v1815_v11, %v1795_v59  ;;  %v337_v20 = vsel %vm2691_vm15, %v1816_v10, %v1805_v2  ;;  %vm2693_vm15 = vcmask 785408   ;;  %v1755_v2 = vunpack.i.l.bf16 %v2268_v25 }
 0x115   :  { %v1839_v21 = vpop.permute.xlu1 %1838  ;;  %v1819_v27 = vpop.permute.xlu0 %1818  ;;  %v1615_v29 = vpack.c.bf16 %v194_v15, %v179_v14  ;;  %v1632_v30 = vpack.c.bf16 %v337_v20, %v323_v19  ;;  %v234_v3 = vsel %vm2693_vm15, %v1835_v49, %v1836_v48  ;;  %v247_v11 = vsel %vm245_vm12, %v1780_v56, %v1781_v53 }
 0x116   :  { %v1821_v31 = vunpack.i.h.bf16 %v1819_v27  ;;  %v1820_v33 = vunpack.i.l.bf16 %v1819_v27  ;;  %v1841_v51 = vunpack.i.h.bf16 %v1839_v21  ;;  %v1840_v52 = vunpack.i.l.bf16 %v1839_v21 }
 0x117   :  { %1616 = vmatpush1.bf16.msra.mxu0 %v1615_v29  ;;  %1633 = vmatpush1.bf16.msra.mxu1 %v1632_v30  ;;  %v386_v25 = vsel %vm245_vm12, %v1785_v58, %v1786_v57  ;;  %v1621_v12 = vpack.c.bf16 %v247_v11, %v234_v3  ;;  %v246_v19 = vsel %vm245_vm12, %v1755_v2, %v1780_v56  ;;  %v1583_v56 = vld [vmem:[%s2688_s1 + $0x18] sm:$0xff] }
 0x118   :  { %v221_v38 = vsel %vm2692_vm11, %v1820_v33, %v1821_v31  ;;  %v374_v46 = vsel %vm2693_vm15, %v1840_v52, %v1841_v51  ;;  %v385_v20 = vsel %vm245_vm12, %v1756_v22, %v1785_v58  ;;  %v1582_v51 = vld [vmem:[%s2688_s1 + $0x10] sm:$0xff] }
 0x119   :  { %v1844_v40 = vpop.permute.xlu1 %1843  ;;  %v1824_v41 = vpop.permute.xlu0 %1823  ;;  %v1617_v42 = vpack.c.bf16 %v221_v38, %v208_v37  ;;  %v1638_v14 = vpack.c.bf16 %v386_v25, %v374_v46 }
 0x11a   :  { %v1826_v44 = vunpack.i.h.bf16 %v1824_v41  ;;  %v1825_v45 = vunpack.i.l.bf16 %v1824_v41  ;;  %v1846_v62 = vunpack.i.h.bf16 %v1844_v40  ;;  %v1845_v63 = vunpack.i.l.bf16 %v1844_v40 }
 0x11b   :  { %1618 = vmatprep.subr.bf16.mxu0 %v1617_v42 }
 0x11c   :  { %v362_v55 = vsel %vm2692_vm11, %v1825_v45, %v1826_v44  ;;  %v233_v15 = vsel %vm2693_vm15, %v1845_v63, %v1835_v49  ;;  %v373_v13 = vsel %vm2693_vm15, %v1846_v62, %v1840_v52  ;;  %vm2697_vm15 = vcmask 588800   ;;  %v596_v49 = vld [vmem:[%s2688_s1] sm:$0xff] }
 0x11d   :  { %v255_v59 = vpop.permute.xlu1 %254  ;;  %v1829_v61 = vpop.permute.xlu0 %1828  ;;  %v1634_v60 = vpack.c.bf16 %v362_v55, %v350_v54  ;;  %v1623_v27 = vpack.c.bf16 %v246_v19, %v233_v15  ;;  %v1640_v29 = vpack.c.bf16 %v385_v20, %v373_v13  ;;  %v597_v55 = vld [vmem:[%s2688_s1 + $0x8] sm:$0xff] }
 0x11e   :  { %v1831_v0 = vunpack.i.h.bf16 %v1829_v61  ;;  %v1830_v1 = vunpack.i.l.bf16 %v1829_v61 }
 0x11f   :  { %1635 = vmatprep.subr.bf16.mxu1 %v1634_v60 }
 0x120   :  { %v220_v50 = vsel %vm2692_vm11, %v1830_v1, %v1820_v33  ;;  %v361_v6 = vsel %vm2692_vm11, %v1831_v0, %v1825_v45  ;;  %vm258_vm11 = vcmask 769024  }
 0x121   :  { %v394_v7 = vpop.permute.xlu1 %393  ;;  %v257_v8 = vpop.permute.xlu0 %256  ;;  %v1619_v9 = vpack.c.bf16 %v220_v50, %v207_v4  ;;  %v1636_v10 = vpack.c.bf16 %v361_v6, %v349_v5 }
 0x122   :  { %v260_v33 = vsel %vm258_vm11, %v255_v59, %v257_v8 }
 0x123   :  { %1620 = vmatpush1.bf16.msra.mxu0 %v1619_v9  ;;  %1637 = vmatpush1.bf16.msra.mxu1 %v1636_v10 }
 0x124   :  { %1622 = vmatprep.subr.bf16.mxu0 %v1621_v12  ;;  %1639 = vmatprep.subr.bf16.mxu1 %v1638_v14 }
 0x125   :  { %v396_v21 = vpop.permute.xlu0 %395  ;;  %v253_v31 = vpop.permute.xlu1 %252 }
 0x126   :  { %v398_v30 = vsel %vm258_vm11, %v394_v7, %v396_v21  ;;  %v259_v37 = vsel %vm258_vm11, %v253_v31, %v255_v59 }
 0x127   :  { %1624 = vmatpush1.bf16.msra.mxu0 %v1623_v27  ;;  %1641 = vmatpush1.bf16.msra.mxu1 %v1640_v29 }
 0x128   :  { %466 = vmatprep.subr.mxu0 %v260_v33  ;;  %537 = vmatprep.subr.mxu1 %v398_v30 }
 0x129   :  { %v392_v35 = vpop.permute.xlu0 %391 }
 0x12a   :  { %v397_v38 = vsel %vm258_vm11, %v392_v35, %v394_v7 }
 0x12b   :  { %467 = vmatpush1.msra.mxu0 %v259_v37  ;;  %538 = vmatpush1.msra.mxu1 %v397_v38 }
 0x12c   :  { %1580 = vmatmul.mubr.msk.f32.vlgmr.msra.gmra.mrb[0].mxu0 %vm2697_vm15, %v403_v36  ;;  %1581 = vmatmul.mubr.msk.f32.vlgmr.msra.gmra.mrb[0].mxu1 %vm2697_vm15, %v403_v36 }
 0x12d   :  { %1001 = vmatprep.mubr.f32.mxu0 %v2110_v18  ;;  %1072 = vmatprep.mubr.f32.mxu1 %v2110_v18 }
 0x136   :  { %v444_v40 = vpop.permute.xlu1 %443 }
 0x1ff   :  { %v516_v41 = vpop.f32.mrb[0].mxu0  ;;  %v587_v42 = vpop.f32.mrb[0].mxu1 }
 0x200   :  { %v517_v43 = vadd.f32 %v516_v41, %v444_v40  ;;  %v588_v44 = vadd.f32 %v587_v42, %v444_v40  ;;  %v518_v45 = vpop.f32.mrb[1].mxu0  ;;  %v589_v48 = vpop.f32.mrb[1].mxu1 }
 0x201   :  { %v519_v52 = vadd.f32 %v518_v45, %v444_v40  ;;  %v590_v47 = vadd.f32 %v589_v48, %v444_v40 }
 0x202   :  { %v592_v53 = vmax.f32 %v517_v43, 0.0  ;;  %v594_v54 = vmax.f32 %v588_v44, 0.0 }
 0x203   :  { %v593_v57 = vmax.f32 %v519_v52, 0.0  ;;  %v595_v58 = vmax.f32 %v590_v47, 0.0 }
 0x204   :  { %v601_v59 = vadd.f32 %v596_v49, %v592_v53  ;;  %v603_v61 = vadd.f32 %v1582_v51, %v594_v54 }
 0x205   :  { %v602_v60 = vadd.f32 %v597_v55, %v593_v57  ;;  %v604_v62 = vadd.f32 %v1583_v56, %v595_v58 }
 0x206   :  { %v605_v63 = vsel %vm2150_vm1, %v601_v59, 0.0  ;;  %v607_v0 = vsel %vm2173_vm5, %v603_v61, 0.0  ;;  %v609_v50 = vsel %vm2154_vm2, %v601_v59, 0.0  ;;  %v611_v7 = vsel %vm2188_vm7, %v603_v61, 0.0 }
 0x207   :  { %v1853_v1 = vpack.i.bf16 %v604_v62, %v603_v61  ;;  %v1848_v22 = vpack.i.bf16 %v602_v60, %v601_v59  ;;  %v606_v2 = vsel %vm2167_vm4, %v602_v60, 0.0  ;;  %v608_v3 = vsel %vm2178_vm6, %v604_v62, 0.0 }
 0x208   :  { %v1858_v46 = vpack.i.bf16 %v606_v2, %v605_v63  ;;  %v1863_v4 = vpack.i.bf16 %v608_v3, %v607_v0  ;;  %v610_v5 = vsel %vm2163_vm3, %v602_v60, 0.0  ;;  %v612_v6 = vsel %vm2194_vm8, %v604_v62, 0.0  ;;  %v1585_v0 = vld [vmem:[%s2686_s3 + $0x8] sm:$0xff] }
 0x209   :  { %1854 = vrot.lane.b32.xlu1 %v1853_v1, %s2101_s22  ;;  %1849 = vrot.lane.b32.xlu0 %v1848_v22, %s2101_s22 }
 0x20d   :  { %638 = vrot.lane.b32.xlu1 %v609_v50, %s2101_s22  ;;  %1859 = vrot.lane.b32.xlu0 %v1858_v46, %s2101_s22 }
 0x211   :  { %1864 = vrot.lane.b32.xlu1 %v1863_v4, %s2101_s22  ;;  %640 = vrot.lane.b32.xlu0 %v610_v5, %s2101_s22 }
 0x215   :  { %778 = vrot.lane.b32.xlu1 %v612_v6, %s2101_s22  ;;  %776 = vrot.lane.b32.xlu0 %v611_v7, %s2101_s22 }
 0x27b   :  { %v1855_v8 = vpop.permute.xlu1 %1854  ;;  %v1850_v9 = vpop.permute.xlu0 %1849 }
 0x27c   :  { %v1857_v10 = vunpack.i.h.bf16 %v1855_v8  ;;  %v1856_v11 = vunpack.i.l.bf16 %v1855_v8  ;;  %v1851_v25 = vunpack.i.l.bf16 %v1850_v9  ;;  %v1852_v21 = vunpack.i.h.bf16 %v1850_v9 }
 0x27e   :  { %v772_v12 = vsel %vm2695_vm9, 0.0, %v1856_v11  ;;  %v634_v14 = vsel %vm2695_vm9, 0.0, %v1851_v25  ;;  %v773_v20 = vsel %vm2695_vm9, %v1857_v10, 0.0  ;;  %v769_v27 = vsel %vm2695_vm9, %v1856_v11, %v1857_v10 }
 0x27f   :  { %v639_v15 = vpop.permute.xlu1 %638  ;;  %v1860_v13 = vpop.permute.xlu0 %1859  ;;  %v1873_v19 = vpack.i.bf16 %v772_v12, %v634_v14  ;;  %v1888_v31 = vpack.i.bf16 %v773_v20, %v769_v27  ;;  %v635_v33 = vsel %vm2695_vm9, %v1852_v21, 0.0  ;;  %v631_v36 = vsel %vm2695_vm9, %v1851_v25, %v1852_v21 }
 0x280   :  { %v2393_v37 = vunpack.i.l.bf16 %v1860_v13  ;;  %v1883_v40 = vpack.i.bf16 %v635_v33, %v631_v36  ;;  %v645_v41 = vsel %vm2695_vm9, 0.0, %v639_v15  ;;  %v1862_v49 = vunpack.i.h.bf16 %v1860_v13 }
 0x281   :  { %1874 = vrot.lane.b32.xlu1 %v1873_v19, %s2103_s23  ;;  %1869 = vrot.lane.b32.xlu0 %v1873_v19, %s2102_s0 }
 0x282   :  { %v623_v45 = vsel %vm2695_vm9, 0.0, %v2393_v37  ;;  %v624_v53 = vsel %vm2695_vm9, %v1862_v49, 0.0  ;;  %v619_v55 = vsel %vm2695_vm9, %v2393_v37, %v1862_v49 }
 0x283   :  { %v1865_v29 = vpop.permute.xlu1 %1864  ;;  %v641_v30 = vpop.permute.xlu0 %640  ;;  %v1938_v59 = vpack.i.bf16 %v624_v53, %v619_v55 }
 0x284   :  { %v2388_v35 = vunpack.i.l.bf16 %v1865_v29  ;;  %v642_v51 = vsel %vm2695_vm9, %v639_v15, %v641_v30  ;;  %v646_v52 = vsel %vm2695_vm9, %v641_v30, 0.0  ;;  %v1867_v54 = vunpack.i.h.bf16 %v1865_v29 }
 0x285   :  { %1889 = vrot.lane.b32.xlu1 %v1888_v31, %s2102_s0  ;;  %1879 = vrot.lane.b32.xlu0 %v1873_v19, %s2104_s24  ;;  %v1933_v56 = vpack.i.bf16 %v646_v52, %v642_v51 }
 0x286   :  { %v761_v43 = vsel %vm2695_vm9, 0.0, %v2388_v35  ;;  %v762_v61 = vsel %vm2695_vm9, %v1867_v54, 0.0  ;;  %v757_v60 = vsel %vm2695_vm9, %v2388_v35, %v1867_v54 }
 0x287   :  { %v777_v38 = vpop.permute.xlu0 %776  ;;  %v1898_v48 = vpack.i.bf16 %v761_v43, %v623_v45  ;;  %v779_v47 = vpop.permute.xlu1 %778  ;;  %v1948_v63 = vpack.i.bf16 %v762_v61, %v757_v60 }
 0x288   :  { %v783_v42 = vsel %vm2695_vm9, 0.0, %v777_v38  ;;  %v784_v57 = vsel %vm2695_vm9, %v779_v47, 0.0  ;;  %v780_v58 = vsel %vm2695_vm9, %v777_v38, %v779_v47 }
 0x289   :  { %1884 = vrot.lane.b32.xlu0 %v1883_v40, %s2102_s0  ;;  %v1893_v44 = vpack.i.bf16 %v783_v42, %v645_v41  ;;  %v1943_v62 = vpack.i.bf16 %v784_v57, %v780_v58 }
 0x28b   :  { %1894 = vrot.lane.b32.xlu1 %v1893_v44, %s2105_s25 }
 0x28d   :  { %1899 = vrot.lane.b32.xlu0 %v1898_v48, %s2106_s26 }
 0x28f   :  { %1904 = vrot.lane.b32.xlu1 %v1883_v40, %s2103_s23 }
 0x291   :  { %1914 = vrot.lane.b32.xlu0 %v1893_v44, %s2108_s28 }
 0x293   :  { %1909 = vrot.lane.b32.xlu1 %v1888_v31, %s2103_s23 }
 0x295   :  { %1919 = vrot.lane.b32.xlu0 %v1883_v40, %s2104_s24 }
 0x297   :  { %1929 = vrot.lane.b32.xlu1 %v1898_v48, %s2107_s27 }
 0x299   :  { %1924 = vrot.lane.b32.xlu0 %v1888_v31, %s2104_s24 }
 0x29b   :  { %1934 = vrot.lane.b32.xlu1 %v1933_v56, %s2105_s25 }
 0x29d   :  { %1939 = vrot.lane.b32.xlu0 %v1938_v59, %s2106_s26 }
 0x29f   :  { %1944 = vrot.lane.b32.xlu1 %v1943_v62, %s2105_s25 }
 0x2a1   :  { %1949 = vrot.lane.b32.xlu0 %v1948_v63, %s2106_s26 }
 0x2a3   :  { %1964 = vrot.lane.b32.xlu1 %v1938_v59, %s2107_s27 }
 0x2a5   :  { %1954 = vrot.lane.b32.xlu0 %v1933_v56, %s2108_s28 }
 0x2a7   :  { %1969 = vrot.lane.b32.xlu1 %v1948_v63, %s2107_s27 }
 0x2a9   :  { %1959 = vrot.lane.b32.xlu0 %v1943_v62, %s2108_s28 }
 0x2ab   :  { %741 = vrot.lane.b32.xlu1 %v642_v51, %s2109_s29 }
 0x2ad   :  { %743 = vrot.lane.b32.xlu0 %v646_v52, %s2109_s29 }
 0x2af   :  { %879 = vrot.lane.b32.xlu1 %v780_v58, %s2109_s29 }
 0x2b1   :  { %881 = vrot.lane.b32.xlu0 %v784_v57, %s2109_s29 }
 0x2b3   :  { %739 = vrot.lane.b32.xlu1 %v645_v41, %s2109_s29 }
 0x2b5   :  { %877 = vrot.lane.b32.xlu0 %v783_v42, %s2109_s29 }
 0x2b7   :  { %931 = vperm.xlu1 %1847, %v1585_v0  }
 0x2f3   :  { %v2437_v1 = vpop.permute.xlu1 %1874  ;;  %v1870_v22 = vpop.permute.xlu0 %1869 }
 0x2f4   :  { %v1872_v46 = vunpack.i.h.bf16 %v1870_v22  ;;  %v1871_v10 = vunpack.i.l.bf16 %v1870_v22  ;;  %v1876_v54 = vunpack.i.l.bf16 %v2437_v1  ;;  %v1877_v59 = vunpack.i.h.bf16 %v2437_v1 }
 0x2f7   :  { %v1890_v2 = vpop.permute.xlu1 %1889  ;;  %v2439_v3 = vpop.permute.xlu0 %1879 }
 0x2f8   :  { %v1892_v4 = vunpack.i.h.bf16 %v1890_v2  ;;  %v1891_v50 = vunpack.i.l.bf16 %v1890_v2 }
 0x2fa   :  { %v795_v5 = vsel %vm2694_vm10, %v1872_v46, %v1891_v50  ;;  %v796_v6 = vsel %vm2694_vm10, %v1891_v50, %v1892_v4 }
 0x2fb   :  { %v1661_v7 = vpack.c.bf16 %v795_v5, %v2388_v35  ;;  %v1885_v8 = vpop.permute.xlu0 %1884  ;;  %v1659_v9 = vpack.c.bf16 %v796_v6, %v757_v60 }
 0x2fc   :  { %v1887_v11 = vunpack.i.h.bf16 %v1885_v8  ;;  %v1886_v25 = vunpack.i.l.bf16 %v1885_v8 }
 0x2fd   :  { %1660 = vmatprep.subr.bf16.mxu1 %v1659_v9  ;;  %v1895_v12 = vpop.permute.xlu1 %1894 }
 0x2fe   :  { %v657_v14 = vsel %vm2694_vm10, %v1871_v10, %v1886_v25  ;;  %1663 = vmatpush1.bf16.msk.msra.mxu1 %vm2275_vm13, %v1661_v7  ;;  %v658_v15 = vsel %vm2694_vm10, %v1886_v25, %v1887_v11  ;;  %v1896_v38 = vunpack.i.l.bf16 %v1895_v12  ;;  %vm2716_vm10 = vcmask 916480  }
 0x2ff   :  { %v1644_v13 = vpack.c.bf16 %v657_v14, %v2393_v37  ;;  %v1900_v19 = vpop.permute.xlu0 %1899  ;;  %v1642_v20 = vpack.c.bf16 %v658_v15, %v619_v55  ;;  %vm2717_vm9 = vmmov %vm2716_vm10  ;;  %v1897_v55 = vunpack.i.h.bf16 %v1895_v12 }
 0x300   :  { %v1901_v41 = vunpack.i.l.bf16 %v1900_v19  ;;  %v1902_v61 = vunpack.i.h.bf16 %v1900_v19 }
 0x301   :  { %v1905_v21 = vpop.permute.xlu1 %1904  ;;  %1643 = vmatprep.subr.bf16.mxu0 %v1642_v20 }
 0x302   :  { %1646 = vmatpush1.bf16.msk.msra.mxu0 %vm2275_vm13, %v1644_v13  ;;  %v1906_v44 = vunpack.i.l.bf16 %v1905_v21  ;;  %v1907_v63 = vunpack.i.h.bf16 %v1905_v21 }
 0x303   :  { %v2451_v27 = vpop.permute.xlu0 %1914 }
 0x304   :  { %v697_v0 = vsel %vm206_vm0, %v1876_v54, %v1906_v44  ;;  %v1917_v11 = vunpack.i.h.bf16 %v2451_v27  ;;  %v1916_v25 = vunpack.i.l.bf16 %v2451_v27  ;;  %v698_v20 = vsel %vm206_vm0, %v1906_v44, %v1907_v63 }
 0x305   :  { %v2453_v29 = vpop.permute.xlu1 %1909  ;;  %v1882_v63 = vunpack.i.h.bf16 %v2439_v3 }
 0x306   :  { %v1912_v15 = vunpack.i.h.bf16 %v2453_v29  ;;  %v1911_v13 = vunpack.i.l.bf16 %v2453_v29 }
 0x307   :  { %v2455_v30 = vpop.permute.xlu0 %1919 }
 0x308   :  { %v1922_v1 = vunpack.i.h.bf16 %v2455_v30  ;;  %v1921_v7 = vunpack.i.l.bf16 %v2455_v30  ;;  %v836_v54 = vsel %vm206_vm0, %v1911_v13, %v1912_v15 }
 0x309   :  { %v2457_v31 = vpop.permute.xlu1 %1929 }
 0x30a   :  { %v1931_v27 = vunpack.i.l.bf16 %v2457_v31  ;;  %v734_v29 = vsel %vm245_vm12, %v1921_v7, %v1922_v1 }
 0x30b   :  { %v2459_v33 = vpop.permute.xlu0 %1924 }
 0x30d   :  { %v1935_v35 = vpop.permute.xlu1 %1934 }
 0x30e   :  { %v1937_v36 = vunpack.i.h.bf16 %v1935_v35  ;;  %v1936_v37 = vunpack.i.l.bf16 %v1935_v35 }
 0x30f   :  { %v1940_v40 = vpop.permute.xlu0 %1939 }
 0x310   :  { %v1942_v42 = vunpack.i.h.bf16 %v1940_v40  ;;  %v1941_v43 = vunpack.i.l.bf16 %v1940_v40  ;;  %v671_v45 = vsel %vm2696_vm14, %v1896_v38, %v1936_v37  ;;  %v672_v49 = vsel %vm2696_vm14, %v1936_v37, %v1937_v36 }
 0x311   :  { %v1945_v48 = vpop.permute.xlu1 %1944 }
 0x312   :  { %v685_v51 = vsel %vm2716_vm10, %v1901_v41, %v1941_v43  ;;  %v1947_v52 = vunpack.i.h.bf16 %v1945_v48  ;;  %v1946_v47 = vunpack.i.l.bf16 %v1945_v48  ;;  %v686_v53 = vsel %vm2717_vm9, %v1941_v43, %v1942_v42  ;;  %vm2718_vm10 = vmmov %vm2717_vm9 }
 0x313   :  { %v1649_v56 = vpack.c.bf16 %v685_v51, %v671_v45  ;;  %v1950_v57 = vpop.permute.xlu0 %1949  ;;  %v1647_v58 = vpack.c.bf16 %v686_v53, %v672_v49  ;;  %v1927_v42 = vunpack.i.h.bf16 %v2459_v33  ;;  %v1926_v43 = vunpack.i.l.bf16 %v2459_v33 }
 0x314   :  { %v1952_v60 = vunpack.i.h.bf16 %v1950_v57  ;;  %v1951_v62 = vunpack.i.l.bf16 %v1950_v57  ;;  %v809_v22 = vsel %vm2696_vm14, %v1897_v55, %v1946_v47  ;;  %v810_v46 = vsel %vm2696_vm14, %v1946_v47, %v1947_v52 }
 0x315   :  { %v1965_v2 = vpop.permute.xlu1 %1964  ;;  %1648 = vmatprep.subr.bf16.mxu0 %v1647_v58  ;;  %v1881_v48 = vunpack.i.l.bf16 %v2439_v3  ;;  %v835_v49 = vsel %vm206_vm0, %v1877_v59, %v1911_v13  ;;  %v1932_v57 = vunpack.i.h.bf16 %v2457_v31  ;;  %v871_v31 = vsel %vm245_vm12, %v1882_v63, %v1926_v43  ;;  %v1584_v3 = vld [vmem:[%s2687_s2 + $0x8] sm:$0xff] }
 0x316   :  { %v823_v4 = vsel %vm2717_vm9, %v1902_v61, %v1951_v62  ;;  %v1967_v50 = vunpack.i.h.bf16 %v1965_v2  ;;  %v1966_v5 = vunpack.i.l.bf16 %v1965_v2  ;;  %1650 = vmatpush1.bf16.msra.mxu0 %v1649_v56  ;;  %v824_v6 = vsel %vm2718_vm10, %v1951_v62, %v1952_v60 }
 0x317   :  { %v1666_v8 = vpack.c.bf16 %v823_v4, %v809_v22  ;;  %v1955_v9 = vpop.permute.xlu0 %1954  ;;  %v1664_v10 = vpack.c.bf16 %v824_v6, %v810_v46  ;;  %vm2719_vm9 = vcmask 785408   ;;  %vm2720_vm10 = vcmask 900096  }
 0x318   :  { %v1957_v12 = vunpack.i.h.bf16 %v1955_v9  ;;  %v1956_v14 = vunpack.i.l.bf16 %v1955_v9  ;;  %v722_v21 = vsel %vm2719_vm9, %v1966_v5, %v1967_v50  ;;  %vm2721_vm14 = vmmov %vm2720_vm10  ;;  %v721_v51 = vsel %vm2719_vm9, %v1931_v27, %v1966_v5 }
 0x319   :  { %v1970_v19 = vpop.permute.xlu1 %1969  ;;  %1665 = vmatprep.subr.bf16.mxu1 %v1664_v10  ;;  %v1655_v47 = vpack.c.bf16 %v734_v29, %v722_v21  ;;  %vm2723_vm15 = vmmov %vm2719_vm9  ;;  %v733_v56 = vsel %vm245_vm12, %v1881_v48, %v1921_v7  ;;  %v872_v62 = vsel %vm245_vm12, %v1926_v43, %v1927_v42 }
 0x31a   :  { %v709_v30 = vsel %vm2720_vm10, %v1916_v25, %v1956_v14  ;;  %v1972_v35 = vunpack.i.h.bf16 %v1970_v19  ;;  %v1971_v36 = vunpack.i.l.bf16 %v1970_v19  ;;  %1667 = vmatpush1.bf16.msra.mxu1 %v1666_v8  ;;  %v710_v37 = vsel %vm2721_vm14, %v1956_v14, %v1957_v12  ;;  %vm2722_vm14 = vmmov %vm2720_vm10 }
 0x31b   :  { %v1653_v38 = vpack.c.bf16 %v709_v30, %v697_v0  ;;  %v1960_v40 = vpop.permute.xlu0 %1959  ;;  %v1651_v41 = vpack.c.bf16 %v710_v37, %v698_v20  ;;  %v1657_v60 = vpack.c.bf16 %v733_v56, %v721_v51 }
 0x31c   :  { %v1962_v44 = vunpack.i.h.bf16 %v1960_v40  ;;  %v1961_v45 = vunpack.i.l.bf16 %v1960_v40  ;;  %v860_v33 = vsel %vm2723_vm15, %v1971_v36, %v1972_v35  ;;  %v859_v0 = vsel %vm2719_vm9, %v1932_v57, %v1971_v36 }
 0x31d   :  { %v742_v52 = vpop.permute.xlu1 %741  ;;  %1652 = vmatprep.subr.bf16.mxu0 %v1651_v41  ;;  %v1672_v2 = vpack.c.bf16 %v872_v62, %v860_v33  ;;  %v1674_v50 = vpack.c.bf16 %v871_v31, %v859_v0  ;;  %vm2724_vm15 = vcmask 588800  }
 0x31e   :  { %v847_v53 = vsel %vm2722_vm14, %v1917_v11, %v1961_v45  ;;  %1654 = vmatpush1.bf16.msra.mxu0 %v1653_v38  ;;  %v848_v55 = vsel %vm2720_vm10, %v1961_v45, %v1962_v44  ;;  %vm2725_vm14 = vmmov %vm2724_vm15 }
 0x31f   :  { %v1670_v58 = vpack.c.bf16 %v847_v53, %v835_v49  ;;  %v744_v59 = vpop.permute.xlu0 %743  ;;  %1656 = vmatprep.subr.bf16.mxu0 %v1655_v47  ;;  %v1668_v61 = vpack.c.bf16 %v848_v55, %v836_v54 }
 0x320   :  { %v746_v46 = vsel %vm258_vm11, %v742_v52, %v744_v59 }
 0x321   :  { %v880_v22 = vpop.permute.xlu1 %879  ;;  %1669 = vmatprep.subr.bf16.mxu1 %v1668_v61 }
 0x322   :  { %1658 = vmatpush1.bf16.msra.mxu0 %v1657_v60  ;;  %1671 = vmatpush1.bf16.msra.mxu1 %v1670_v58 }
 0x323   :  { %v882_v4 = vpop.permute.xlu0 %881  ;;  %953 = vmatprep.subr.mxu0 %v746_v46  ;;  %1673 = vmatprep.subr.bf16.mxu1 %v1672_v2 }
 0x324   :  { %v884_v1 = vsel %vm258_vm11, %v880_v22, %v882_v4 }
 0x325   :  { %v740_v5 = vpop.permute.xlu1 %739 }
 0x326   :  { %v745_v6 = vsel %vm258_vm11, %v740_v5, %v742_v52  ;;  %1675 = vmatpush1.bf16.msra.mxu1 %v1674_v50 }
 0x327   :  { %v878_v7 = vpop.permute.xlu0 %877  ;;  %954 = vmatpush1.msra.mxu0 %v745_v6  ;;  %1024 = vmatprep.subr.mxu1 %v884_v1 }
 0x328   :  { %v883_v8 = vsel %vm258_vm11, %v878_v7, %v880_v22  ;;  %1586 = vmatmul.mubr.msk.f32.vlgmr.msra.gmra.mrb[2].mxu0 %vm2724_vm15, %v1584_v3 }
 0x329   :  { %1479 = vmatprep.mubr.f32.mxu0 %v2110_v18 }
 0x32a   :  { %1025 = vmatpush1.msra.mxu1 %v883_v8 }
 0x32b   :  { %1587 = vmatmul.mubr.msk.f32.vlgmr.msra.gmra.mrb[2].mxu1 %vm2725_vm14, %v1584_v3 }
 0x32c   :  { %1550 = vmatprep.mubr.f32.mxu1 %v2110_v18 }
 0x336   :  { %v932_v9 = vpop.permute.xlu1 %931 }
 0x3fb   :  { %v1003_v10 = vpop.f32.mrb[2].mxu0 }
 0x3fc   :  { %v1004_v11 = vadd.f32 %v1003_v10, %v932_v9  ;;  %v1005_v25 = vpop.f32.mrb[3].mxu0 }
 0x3fd   :  { %v1006_v12 = vadd.f32 %v1005_v25, %v932_v9 }
 0x3fe   :  { %v1079_v14 = vmax.f32 %v1004_v11, 0.0  ;;  %v1074_v15 = vpop.f32.mrb[2].mxu1 }
 0x3ff   :  { %v1080_v13 = vmax.f32 %v1006_v12, 0.0  ;;  %v1075_v19 = vadd.f32 %v1074_v15, %v932_v9  ;;  %v1076_v20 = vpop.f32.mrb[3].mxu1 }
 0x400   :  { %1561 = vst [vmem:[%s2689_s4] sm:$0xff] %v1079_v14  ;;  %v1077_v21 = vadd.f32 %v1076_v20, %v932_v9  ;;  %v1083_v30 = vsel %vm2150_vm1, %v1079_v14, 0.0  ;;  %v1087_v41 = vsel %vm2154_vm2, %v1079_v14, 0.0  ;;  %vm2726_vm1 = vcmask 138240  }
 0x401   :  { %1562 = vst [vmem:[%s2689_s4 + $0x8] sm:$0xff] %v1080_v13  ;;  %v1081_v18 = vmax.f32 %v1075_v19, 0.0  ;;  %v1973_v35 = vpack.i.bf16 %v1080_v13, %v1079_v14  ;;  %v1084_v36 = vsel %vm2167_vm4, %v1080_v13, 0.0  ;;  %v1088_v26 = vsel %vm2163_vm3, %v1080_v13, 0.0  ;;  %vm2727_vm2 = vmmov %vm2726_vm1  ;;  %v1589_v14 = vld [vmem:[%s2686_s3 + $0x10] sm:$0xff] }
 0x402   :  { %v1082_v37 = vmax.f32 %v1077_v21, 0.0  ;;  %v1983_v27 = vpack.i.bf16 %v1084_v36, %v1083_v30  ;;  %vm2728_vm3 = vmmov %vm2726_vm1 }
 0x403   :  { %1592 = vst [vmem:[%s2689_s4 + $0x10] sm:$0xff] %v1081_v18  ;;  %1974 = vrot.lane.b32.xlu0 %v1973_v35, %s2101_s22  ;;  %v1085_v16 = vsel %vm2173_vm5, %v1081_v18, 0.0  ;;  %v1089_v28 = vsel %vm2188_vm7, %v1081_v18, 0.0  ;;  %vm2729_vm4 = vmmov %vm2726_vm1 }
 0x404   :  { %1593 = vst [vmem:[%s2689_s4 + $0x18] sm:$0xff] %v1082_v37  ;;  %v1978_v38 = vpack.i.bf16 %v1082_v37, %v1081_v18  ;;  %v1086_v24 = vsel %vm2178_vm6, %v1082_v37, 0.0  ;;  %v1090_v29 = vsel %vm2194_vm8, %v1082_v37, 0.0  ;;  %vm2730_vm5 = vmmov %vm2726_vm1 }
 0x405   :  { %v1988_v40 = vpack.i.bf16 %v1086_v24, %v1085_v16  ;;  %vm2731_vm6 = vmmov %vm2726_vm1 }
 0x406   :  { %1979 = vrot.lane.b32.xlu1 %v1978_v38, %s2101_s22  ;;  %vm2732_vm7 = vmmov %vm2726_vm1 }
 0x407   :  { %1984 = vrot.lane.b32.xlu0 %v1983_v27, %s2101_s22  ;;  %vm2733_vm8 = vmmov %vm2726_vm1 }
 0x408   :  { %vm2734_vm10 = vmmov %vm2726_vm1 }
 0x409   :  { %vm2735_vm9 = vmmov %vm2726_vm1 }
 0x40a   :  { %1116 = vrot.lane.b32.xlu1 %v1087_v41, %s2101_s22  ;;  %vm2736_vm15 = vmmov %vm2726_vm1 }
 0x40b   :  { %1118 = vrot.lane.b32.xlu0 %v1088_v26, %s2101_s22  ;;  %vm2737_vm14 = vmmov %vm2726_vm1 }
 0x40e   :  { %1989 = vrot.lane.b32.xlu1 %v1988_v40, %s2101_s22 }
 0x40f   :  { %1254 = vrot.lane.b32.xlu0 %v1089_v28, %s2101_s22 }
 0x412   :  { %1256 = vrot.lane.b32.xlu1 %v1090_v29, %s2101_s22 }
 0x475   :  { %v1975_v17 = vpop.permute.xlu0 %1974 }
 0x476   :  { %v1976_v42 = vunpack.i.l.bf16 %v1975_v17  ;;  %v1977_v52 = vunpack.i.h.bf16 %v1975_v17 }
 0x478   :  { %v1980_v43 = vpop.permute.xlu1 %1979  ;;  %v1112_v48 = vsel %vm2726_vm1, 0.0, %v1976_v42  ;;  %v1113_v33 = vsel %vm2730_vm5, %v1977_v52, 0.0  ;;  %v1109_v58 = vsel %vm2731_vm6, %v1976_v42, %v1977_v52  ;;  %vm2741_vm5 = vmmov %vm2726_vm1 }
 0x479   :  { %v1982_v44 = vunpack.i.h.bf16 %v1980_v43  ;;  %v1981_v23 = vunpack.i.l.bf16 %v1980_v43  ;;  %v1985_v45 = vpop.permute.xlu0 %1984  ;;  %v2008_v63 = vpack.i.bf16 %v1113_v33, %v1109_v58  ;;  %vm2742_vm6 = vmmov %vm2726_vm1 }
 0x47a   :  { %v2560_v60 = vunpack.i.l.bf16 %v1985_v45  ;;  %v1987_v46 = vunpack.i.h.bf16 %v1985_v45 }
 0x47b   :  { %v1250_v49 = vsel %vm2727_vm2, 0.0, %v1981_v23  ;;  %v1251_v47 = vsel %vm2728_vm3, %v1982_v44, 0.0  ;;  %v1247_v34 = vsel %vm2729_vm4, %v1981_v23, %v1982_v44  ;;  %vm2738_vm2 = vmmov %vm2726_vm1 }
 0x47c   :  { %v1117_v51 = vpop.permute.xlu1 %1116  ;;  %v1998_v32 = vpack.i.bf16 %v1250_v49, %v1112_v48  ;;  %v2013_v55 = vpack.i.bf16 %v1251_v47, %v1247_v34  ;;  %v1101_v22 = vsel %vm2735_vm9, 0.0, %v2560_v60  ;;  %v1102_v5 = vsel %vm2726_vm1, %v1987_v46, 0.0  ;;  %vm2739_vm3 = vmmov %vm2726_vm1 }
 0x47d   :  { %v1119_v53 = vpop.permute.xlu0 %1118  ;;  %v1123_v59 = vsel %vm2732_vm7, 0.0, %v1117_v51  ;;  %vm2740_vm4 = vmmov %vm2726_vm1  ;;  %vm2743_vm7 = vcmask 1039360  }
 0x47e   :  { %1999 = vrot.lane.b32.xlu1 %v1998_v32, %s2103_s23  ;;  %1994 = vrot.lane.b32.xlu0 %v1998_v32, %s2102_s0  ;;  %v1120_v31 = vsel %vm2736_vm15, %v1117_v51, %v1119_v53  ;;  %v1124_v4 = vsel %vm2737_vm14, %v1119_v53, 0.0  ;;  %v1097_v8 = vsel %vm2740_vm4, %v2560_v60, %v1987_v46  ;;  %vm2746_vm9 = vmmov %vm2743_vm7  ;;  %vm2749_vm14 = vcmask 916480  }
 0x47f   :  { %v2058_v3 = vpack.i.bf16 %v1124_v4, %v1120_v31  ;;  %v2063_v10 = vpack.i.bf16 %v1102_v5, %v1097_v8  ;;  %vm2750_vm1 = vmmov %vm2749_vm14 }
 0x480   :  { %v1990_v54 = vpop.permute.xlu1 %1989 }
 0x481   :  { %v2553_v56 = vunpack.i.l.bf16 %v1990_v54  ;;  %v1255_v57 = vpop.permute.xlu0 %1254  ;;  %v1992_v6 = vunpack.i.h.bf16 %v1990_v54 }
 0x482   :  { %v1261_v61 = vsel %vm2733_vm8, 0.0, %v1255_v57  ;;  %2014 = vrot.lane.b32.xlu1 %v2013_v55, %s2102_s0  ;;  %2004 = vrot.lane.b32.xlu0 %v1998_v32, %s2104_s24  ;;  %vm2744_vm8 = vmmov %vm2743_vm7 }
 0x483   :  { %v2018_v62 = vpack.i.bf16 %v1261_v61, %v1123_v59  ;;  %v1239_v0 = vsel %vm2734_vm10, 0.0, %v2553_v56  ;;  %v1240_v11 = vsel %vm2741_vm5, %v1992_v6, 0.0  ;;  %v1235_v25 = vsel %vm2742_vm6, %v2553_v56, %v1992_v6  ;;  %vm2745_vm10 = vmmov %vm2743_vm7 }
 0x484   :  { %v2023_v2 = vpack.i.bf16 %v1239_v0, %v1101_v22  ;;  %v1257_v50 = vpop.permute.xlu1 %1256  ;;  %v2073_v12 = vpack.i.bf16 %v1240_v11, %v1235_v25  ;;  %vm2754_vm5 = vmmov %vm2750_vm1  ;;  %vm2755_vm6 = vcmask 785408  }
 0x485   :  { %v1258_v1 = vsel %vm2738_vm2, %v1255_v57, %v1257_v50  ;;  %v1262_v7 = vsel %vm2739_vm3, %v1257_v50, 0.0  ;;  %vm2752_vm3 = vmmov %vm2750_vm1 }
 0x486   :  { %2009 = vrot.lane.b32.xlu0 %v2008_v63, %s2102_s0  ;;  %2019 = vrot.lane.b32.xlu1 %v2018_v62, %s2105_s25  ;;  %v2068_v9 = vpack.i.bf16 %v1262_v7, %v1258_v1 }
 0x48a   :  { %2029 = vrot.lane.b32.xlu1 %v2008_v63, %s2103_s23  ;;  %2024 = vrot.lane.b32.xlu0 %v2023_v2, %s2106_s26 }
 0x48e   :  { %2034 = vrot.lane.b32.xlu1 %v2013_v55, %s2103_s23  ;;  %2039 = vrot.lane.b32.xlu0 %v2018_v62, %s2108_s28 }
 0x492   :  { %2054 = vrot.lane.b32.xlu1 %v2023_v2, %s2107_s27  ;;  %2044 = vrot.lane.b32.xlu0 %v2008_v63, %s2104_s24 }
 0x496   :  { %2059 = vrot.lane.b32.xlu1 %v2058_v3, %s2105_s25  ;;  %2049 = vrot.lane.b32.xlu0 %v2013_v55, %s2104_s24 }
 0x49a   :  { %2069 = vrot.lane.b32.xlu1 %v2068_v9, %s2105_s25  ;;  %2064 = vrot.lane.b32.xlu0 %v2063_v10, %s2106_s26 }
 0x49e   :  { %2089 = vrot.lane.b32.xlu1 %v2063_v10, %s2107_s27  ;;  %2074 = vrot.lane.b32.xlu0 %v2073_v12, %s2106_s26 }
 0x4a2   :  { %2094 = vrot.lane.b32.xlu1 %v2073_v12, %s2107_s27  ;;  %2079 = vrot.lane.b32.xlu0 %v2058_v3, %s2108_s28 }
 0x4a6   :  { %1219 = vrot.lane.b32.xlu1 %v1120_v31, %s2109_s29  ;;  %2084 = vrot.lane.b32.xlu0 %v2068_v9, %s2108_s28 }
 0x4aa   :  { %1357 = vrot.lane.b32.xlu1 %v1258_v1, %s2109_s29  ;;  %1221 = vrot.lane.b32.xlu0 %v1124_v4, %s2109_s29 }
 0x4ae   :  { %1217 = vrot.lane.b32.xlu1 %v1123_v59, %s2109_s29  ;;  %1359 = vrot.lane.b32.xlu0 %v1262_v7, %s2109_s29 }
 0x4b2   :  { %1409 = vperm.xlu1 %1847, %v1589_v14   ;;  %1355 = vrot.lane.b32.xlu0 %v1261_v61, %s2109_s29 }
 0x4f0   :  { %v2602_v15 = vpop.permute.xlu1 %1999  ;;  %v1995_v13 = vpop.permute.xlu0 %1994 }
 0x4f1   :  { %v1997_v21 = vunpack.i.h.bf16 %v1995_v13  ;;  %v1996_v24 = vunpack.i.l.bf16 %v1995_v13  ;;  %v2001_v62 = vunpack.i.l.bf16 %v2602_v15  ;;  %v2002_v3 = vunpack.i.h.bf16 %v2602_v15 }
 0x4f4   :  { %v2015_v19 = vpop.permute.xlu1 %2014  ;;  %v2604_v20 = vpop.permute.xlu0 %2004 }
 0x4f5   :  { %v2017_v30 = vunpack.i.h.bf16 %v2015_v19  ;;  %v2016_v18 = vunpack.i.l.bf16 %v2015_v19 }
 0x4f7   :  { %v1273_v35 = vsel %vm2743_vm7, %v1997_v21, %v2016_v18  ;;  %v1274_v36 = vsel %vm2744_vm8, %v2016_v18, %v2017_v30  ;;  %vm2756_vm7 = vcmask 900096  }
 0x4f8   :  { %v1695_v37 = vpack.c.bf16 %v1273_v35, %v2553_v56  ;;  %v2020_v27 = vpop.permute.xlu1 %2019  ;;  %v2010_v16 = vpop.permute.xlu0 %2009  ;;  %v1693_v38 = vpack.c.bf16 %v1274_v36, %v1235_v25  ;;  %vm2757_vm8 = vmmov %vm2756_vm7 }
 0x4f9   :  { %v2012_v40 = vunpack.i.h.bf16 %v2010_v16  ;;  %v2011_v41 = vunpack.i.l.bf16 %v2010_v16  ;;  %v2021_v47 = vunpack.i.l.bf16 %v2020_v27  ;;  %v2022_v63 = vunpack.i.h.bf16 %v2020_v27 }
 0x4fa   :  { %1694 = vmatprep.subr.bf16.mxu1 %v1693_v38 }
 0x4fb   :  { %v1135_v26 = vsel %vm2745_vm10, %v1996_v24, %v2011_v41  ;;  %1697 = vmatpush1.bf16.msk.msra.mxu1 %vm2275_vm13, %v1695_v37  ;;  %v1136_v28 = vsel %vm2746_vm9, %v2011_v41, %v2012_v40  ;;  %vm2758_vm10 = vmmov %vm2755_vm6 }
 0x4fc   :  { %v1678_v29 = vpack.c.bf16 %v1135_v26, %v2560_v60  ;;  %v2030_v17 = vpop.permute.xlu1 %2029  ;;  %v2025_v42 = vpop.permute.xlu0 %2024  ;;  %v1676_v43 = vpack.c.bf16 %v1136_v28, %v1097_v8  ;;  %vm2759_vm9 = vmmov %vm2756_vm7 }
 0x4fd   :  { %v2026_v54 = vunpack.i.l.bf16 %v2025_v42  ;;  %v2031_v33 = vunpack.i.l.bf16 %v2030_v17  ;;  %v2032_v31 = vunpack.i.h.bf16 %v2030_v17  ;;  %v2027_v4 = vunpack.i.h.bf16 %v2025_v42 }
 0x4fe   :  { %1677 = vmatprep.subr.bf16.mxu0 %v1676_v43 }
 0x4ff   :  { %1680 = vmatpush1.bf16.msk.msra.mxu0 %vm2275_vm13, %v1678_v29  ;;  %vm2747_vm13 = vcmask 1031168   ;;  %v1175_v6 = vsel %vm206_vm0, %v2001_v62, %v2031_v33  ;;  %v1176_v35 = vsel %vm206_vm0, %v2031_v33, %v2032_v31  ;;  %v2007_v62 = vunpack.i.h.bf16 %v2604_v20 }
 0x500   :  { %v2616_v44 = vpop.permute.xlu1 %2034  ;;  %v2618_v23 = vpop.permute.xlu0 %2039  ;;  %vm2748_vm15 = vmmov %vm2747_vm13 }
 0x501   :  { %vm2751_vm2 = vmmov %vm2747_vm13  ;;  %v2041_v21 = vunpack.i.l.bf16 %v2618_v23  ;;  %v2037_v36 = vunpack.i.h.bf16 %v2616_v44  ;;  %v2036_v37 = vunpack.i.l.bf16 %v2616_v44  ;;  %v2042_v27 = vunpack.i.h.bf16 %v2618_v23 }
 0x502   :  { %vm2753_vm4 = vmmov %vm2751_vm2 }
 0x504   :  { %v2620_v45 = vpop.permute.xlu1 %2054  ;;  %v2622_v48 = vpop.permute.xlu0 %2044 }
 0x505   :  { %v2047_v25 = vunpack.i.h.bf16 %v2622_v48  ;;  %v2046_v12 = vunpack.i.l.bf16 %v2622_v48  ;;  %v2056_v26 = vunpack.i.l.bf16 %v2620_v45 }
 0x507   :  { %v1212_v43 = vsel %vm245_vm12, %v2046_v12, %v2047_v25 }
 0x508   :  { %v2060_v49 = vpop.permute.xlu1 %2059  ;;  %v2624_v51 = vpop.permute.xlu0 %2049 }
 0x509   :  { %v2062_v32 = vunpack.i.h.bf16 %v2060_v49  ;;  %v2061_v52 = vunpack.i.l.bf16 %v2060_v49  ;;  %v2052_v44 = vunpack.i.h.bf16 %v2624_v51  ;;  %v2051_v23 = vunpack.i.l.bf16 %v2624_v51 }
 0x50a   :  { %v2057_v51 = vunpack.i.h.bf16 %v2620_v45 }
 0x50b   :  { %v1149_v56 = vsel %vm2747_vm13, %v2021_v47, %v2061_v52  ;;  %v1150_v57 = vsel %vm2748_vm15, %v2061_v52, %v2062_v32  ;;  %v2006_v32 = vunpack.i.l.bf16 %v2604_v20  ;;  %v1313_v52 = vsel %vm206_vm0, %v2002_v3, %v2036_v37  ;;  %vm2760_vm13 = vmmov %vm2756_vm7  ;;  %v1588_v20 = vld [vmem:[%s2687_s2 + $0x10] sm:$0xff] }
 0x50c   :  { %v2070_v53 = vpop.permute.xlu1 %2069  ;;  %v2065_v34 = vpop.permute.xlu0 %2064  ;;  %vm2761_vm15 = vmmov %vm2755_vm6 }
 0x50d   :  { %v2067_v55 = vunpack.i.h.bf16 %v2065_v34  ;;  %v2066_v39 = vunpack.i.l.bf16 %v2065_v34  ;;  %v2072_v58 = vunpack.i.h.bf16 %v2070_v53  ;;  %v2071_v59 = vunpack.i.l.bf16 %v2070_v53 }
 0x50e   :  { %v1211_v33 = vsel %vm245_vm12, %v2006_v32, %v2046_v12 }
 0x50f   :  { %v1163_v61 = vsel %vm2749_vm14, %v2026_v54, %v2066_v39  ;;  %v1164_v60 = vsel %vm2750_vm1, %v2066_v39, %v2067_v55  ;;  %v1287_v8 = vsel %vm2751_vm2, %v2022_v63, %v2071_v59  ;;  %v1288_v10 = vsel %vm2753_vm4, %v2071_v59, %v2072_v58  ;;  %vm2762_vm14 = vmmov %vm2755_vm6 }
 0x510   :  { %v1683_v0 = vpack.c.bf16 %v1163_v61, %v1149_v56  ;;  %v2090_v22 = vpop.permute.xlu1 %2089  ;;  %v2075_v2 = vpop.permute.xlu0 %2074  ;;  %v1681_v46 = vpack.c.bf16 %v1164_v60, %v1150_v57  ;;  %v1314_v54 = vsel %vm206_vm0, %v2036_v37, %v2037_v36  ;;  %v1350_v60 = vsel %vm245_vm12, %v2051_v23, %v2052_v44 }
 0x511   :  { %v2077_v50 = vunpack.i.h.bf16 %v2075_v2  ;;  %v2076_v5 = vunpack.i.l.bf16 %v2075_v2  ;;  %v2092_v1 = vunpack.i.h.bf16 %v2090_v22  ;;  %v2091_v7 = vunpack.i.l.bf16 %v2090_v22 }
 0x512   :  { %1682 = vmatprep.subr.bf16.mxu0 %v1681_v46  ;;  %v1349_v22 = vsel %vm245_vm12, %v2007_v62, %v2051_v23  ;;  %vm2763_vm0 = vcmask 588800  }
 0x513   :  { %v1301_v9 = vsel %vm2752_vm3, %v2027_v4, %v2076_v5  ;;  %1684 = vmatpush1.bf16.msra.mxu0 %v1683_v0  ;;  %v1302_v11 = vsel %vm2754_vm5, %v2076_v5, %v2077_v50  ;;  %v1200_v16 = vsel %vm2755_vm6, %v2091_v7, %v2092_v1  ;;  %v1199_v47 = vsel %vm2758_vm10, %v2056_v26, %v2091_v7  ;;  %vm2764_vm12 = vmmov %vm2763_vm0 }
 0x514   :  { %v1700_v14 = vpack.c.bf16 %v1301_v9, %v1287_v8  ;;  %v2095_v15 = vpop.permute.xlu1 %2094  ;;  %v2080_v13 = vpop.permute.xlu0 %2079  ;;  %v1698_v19 = vpack.c.bf16 %v1302_v11, %v1288_v10  ;;  %v1689_v53 = vpack.c.bf16 %v1212_v43, %v1200_v16  ;;  %v1691_v61 = vpack.c.bf16 %v1211_v33, %v1199_v47 }
 0x515   :  { %v2082_v30 = vunpack.i.h.bf16 %v2080_v13  ;;  %v2081_v18 = vunpack.i.l.bf16 %v2080_v13  ;;  %v2097_v38 = vunpack.i.h.bf16 %v2095_v15  ;;  %v2096_v24 = vunpack.i.l.bf16 %v2095_v15 }
 0x516   :  { %1699 = vmatprep.subr.bf16.mxu1 %v1698_v19 }
 0x517   :  { %v1187_v40 = vsel %vm2756_vm7, %v2041_v21, %v2081_v18  ;;  %1701 = vmatpush1.bf16.msra.mxu1 %v1700_v14  ;;  %v1188_v41 = vsel %vm2757_vm8, %v2081_v18, %v2082_v30  ;;  %v1338_v39 = vsel %vm2761_vm15, %v2096_v24, %v2097_v38  ;;  %v1337_v63 = vsel %vm2762_vm14, %v2057_v51, %v2096_v24 }
 0x518   :  { %v1687_v28 = vpack.c.bf16 %v1187_v40, %v1175_v6  ;;  %v1220_v29 = vpop.permute.xlu1 %1219  ;;  %v2085_v17 = vpop.permute.xlu0 %2084  ;;  %v1685_v42 = vpack.c.bf16 %v1188_v41, %v1176_v35  ;;  %v1706_v0 = vpack.c.bf16 %v1350_v60, %v1338_v39  ;;  %v1708_v31 = vpack.c.bf16 %v1349_v22, %v1337_v63 }
 0x519   :  { %v2087_v48 = vunpack.i.h.bf16 %v2085_v17  ;;  %v2086_v49 = vunpack.i.l.bf16 %v2085_v17 }
 0x51a   :  { %1686 = vmatprep.subr.bf16.mxu0 %v1685_v42 }
 0x51b   :  { %v1325_v34 = vsel %vm2759_vm9, %v2042_v27, %v2086_v49  ;;  %1688 = vmatpush1.bf16.msra.mxu0 %v1687_v28  ;;  %v1326_v55 = vsel %vm2760_vm13, %v2086_v49, %v2087_v48 }
 0x51c   :  { %v1704_v56 = vpack.c.bf16 %v1325_v34, %v1313_v52  ;;  %v1358_v57 = vpop.permute.xlu1 %1357  ;;  %v1222_v58 = vpop.permute.xlu0 %1221  ;;  %1690 = vmatprep.subr.bf16.mxu0 %v1689_v53  ;;  %v1702_v59 = vpack.c.bf16 %v1326_v55, %v1314_v54 }
 0x51d   :  { %v1224_v45 = vsel %vm258_vm11, %v1220_v29, %v1222_v58 }
 0x51e   :  { %1703 = vmatprep.subr.bf16.mxu1 %v1702_v59 }
 0x51f   :  { %1692 = vmatpush1.bf16.msra.mxu0 %v1691_v61  ;;  %1705 = vmatpush1.bf16.msra.mxu1 %v1704_v56 }
 0x520   :  { %v1218_v2 = vpop.permute.xlu1 %1217  ;;  %v1360_v46 = vpop.permute.xlu0 %1359  ;;  %1431 = vmatprep.subr.mxu0 %v1224_v45  ;;  %1707 = vmatprep.subr.bf16.mxu1 %v1706_v0 }
 0x521   :  { %v1223_v4 = vsel %vm258_vm11, %v1218_v2, %v1220_v29  ;;  %v1362_v50 = vsel %vm258_vm11, %v1358_v57, %v1360_v46 }
 0x523   :  { %1432 = vmatpush1.msra.mxu0 %v1223_v4  ;;  %1709 = vmatpush1.bf16.msra.mxu1 %v1708_v31 }
 0x524   :  { %v1356_v5 = vpop.permute.xlu0 %1355  ;;  %1590 = vmatmul.mubr.msk.f32.vlgmr.msra.gmra.mrb[4].mxu0 %vm2763_vm0, %v1588_v20  ;;  %1502 = vmatprep.subr.mxu1 %v1362_v50 }
 0x525   :  { %v1361_v3 = vsel %vm258_vm11, %v1356_v5, %v1358_v57 }
 0x527   :  { %1503 = vmatpush1.msra.mxu1 %v1361_v3 }
 0x528   :  { %1591 = vmatmul.mubr.msk.f32.vlgmr.msra.gmra.mrb[4].mxu1 %vm2764_vm12, %v1588_v20 }
 0x531   :  { %v1410_v6 = vpop.permute.xlu1 %1409 }
 0x5f7   :  { %v1481_v1 = vpop.f32.mrb[4].mxu0 }
 0x5f8   :  { %v1482_v7 = vadd.f32 %v1481_v1, %v1410_v6  ;;  %v1483_v8 = vpop.f32.mrb[5].mxu0 }
 0x5f9   :  { %v1484_v9 = vadd.f32 %v1483_v8, %v1410_v6 }
 0x5fa   :  { %v1557_v10 = vmax.f32 %v1482_v7, 0.0 }
 0x5fb   :  { %v1558_v11 = vmax.f32 %v1484_v9, 0.0  ;;  %v1552_v25 = vpop.f32.mrb[4].mxu1 }
 0x5fc   :  { %1563 = vst [vmem:[%s2690_s5] sm:$0xff] %v1557_v10  ;;  %v1553_v12 = vadd.f32 %v1552_v25, %v1410_v6  ;;  %v1554_v14 = vpop.f32.mrb[5].mxu1 }
 0x5fd   :  { %1564 = vst [vmem:[%s2690_s5 + $0x8] sm:$0xff] %v1558_v11  ;;  %v1555_v15 = vadd.f32 %v1554_v14, %v1410_v6 }
 0x5fe   :  { %v1559_v13 = vmax.f32 %v1553_v12, 0.0 }
 0x5ff   :  { %v1560_v19 = vmax.f32 %v1555_v15, 0.0 }
 0x600   :  { %1594 = vst [vmem:[%s2690_s5 + $0x10] sm:$0xff] %v1559_v13 }
 0x601   :  { %1595 = vst [vmem:[%s2690_s5 + $0x18] sm:$0xff] %v1560_v19 }

</bundles_post_ra>
